<compile_context>
chip_gen: v5e
topology: v5e:2x2
jax: 0.10.0
libtpu: 0.0.40
codegen_flags: <defaults>
</compile_context>

<pallas_src>
import functools

import jax
import jax.numpy as jnp
from jax.experimental import pallas as pl
from jax.experimental.pallas import tpu as pltpu


def _round_up(x, m):
    return ((x + m - 1) // m) * m


def _cdiv(a, b):
    return -(-a // b)


def _losswrap_kernel(x_ref, eps_ref,
                     w1_ref, b1_ref,
                     wml_ref, bml_ref,      # fused, lane-aligned [mean | log_var] head
                     wd1_ref, bd1_ref,
                     wd2_ref, bd2_ref,
                     kl_ref, mse_ref,
                     *, n_valid, d_latent, zpad, tiles_per_slot):
    c = pl.program_id(0)          # slot axis ("parallel": sharded across TCs on v7x)
    i = pl.program_id(1)          # reduction over this slot's batch tiles

    # --- init this slot's resident accumulator blocks on its first tile ------
    @pl.when(i == 0)
    def _():
        kl_ref[...] = jnp.zeros_like(kl_ref)
        mse_ref[...] = jnp.zeros_like(mse_ref)

    x_bf = x_ref[...]                                   # (TILE_N, D)  bf16
    eps = eps_ref[...]                                  # (TILE_N, Z)  f32
    tile_n = x_bf.shape[0]

    # Global (unclamped) row index of each row in this block; rows >= n_valid
    # belong to the padded tail of a partial block (or a duplicated overshoot
    # block) and must not contribute to either loss.
    blk = c * tiles_per_slot + i
    row = blk * tile_n + jax.lax.broadcasted_iota(jnp.int32, (tile_n, 1), 0)
    valid = row < n_valid                               # (TILE_N, 1) bool

    # Zero invalid input rows so OOB garbage in a partial block can never reach
    # exp(log_var) / the decoder (select, not multiply => NaN-proof).
    x_bf = jnp.where(valid, x_bf, jnp.zeros_like(x_bf))
    eps = jnp.where(valid, eps, jnp.zeros_like(eps))

    # --- encoder (bf16 matmul inputs, f32 accumulation) -----------------------
    h = jnp.dot(x_bf, w1_ref[...], preferred_element_type=jnp.float32) + b1_ref[...]
    h = jnp.maximum(h, 0.0)                              # ReLU (f32)

    ml = jnp.dot(h.astype(jnp.bfloat16), wml_ref[...],
                 preferred_element_type=jnp.float32) + bml_ref[...]
    mean = ml[:, :d_latent]                              # lane block 0
    log_var = ml[:, zpad:zpad + d_latent]                # starts at a 128-lane boundary

    # --- reparameterization (single exp; reuse s*s = exp(log_var)) ------------
    s = jnp.exp(0.5 * log_var)
    z = mean + s * eps

    # --- decoder ---------------------------------------------------------------
    hd = jnp.dot(z.astype(jnp.bfloat16), wd1_ref[...],
                 preferred_element_type=jnp.float32) + bd1_ref[...]
    hd = jnp.maximum(hd, 0.0)                            # ReLU (f32)
    # TODO(synk): if D grows beyond ~4K, tile wd2 column-blocks and stream the
    # x_hat slices straight into the diff^2 partial sum.
    x_hat = jnp.dot(hd.astype(jnp.bfloat16), wd2_ref[...],
                    preferred_element_type=jnp.float32) + bd2_ref[...]

    # --- masked partial sums (select-mask, NaN/Inf safe) -----------------------
    kl_row = -0.5 * jnp.sum(1.0 + log_var - mean * mean - s * s,
                            axis=-1, keepdims=True)                  # (TILE_N, 1)
    kl_tile = jnp.sum(jnp.where(valid, kl_row, 0.0), axis=0, keepdims=True)   # (1, 1)
    kl_ref[...] = kl_ref[...] + kl_tile                  # broadcast over (1,128) block

    diff = x_bf.astype(jnp.float32) - x_hat
    sq_row = jnp.sum(diff * diff, axis=-1, keepdims=True)            # (TILE_N, 1)
    mse_tile = jnp.sum(jnp.where(valid, sq_row, 0.0), axis=0, keepdims=True)  # (1, 1)
    mse_ref[...] = mse_ref[...] + mse_tile
    # Final 1/N and 1/(N*D) scaling (and the cross-slot sum) happen in the wrapper.


def losswrap_forward(x_nchw, eps, params, *, tile_n=1024, num_slots=2):
    """Returns (kl_loss, mse_loss) f32 scalars, matching LossWrap.forward."""
    n = x_nchw.shape[0]
    # x is the dominant HBM stream: cast it to bf16 once (no padded copy).
    x_flat = x_nchw.reshape(n, -1).astype(jnp.bfloat16)    # (N, D)
    d = x_flat.shape[1]
    z_dim = eps.shape[1]
    eps = eps.astype(jnp.float32)

    # Batch tiling: NO wrapper-side padding; the last block may be partial and
    # is masked in-kernel.  tile_n multiple of 16 (bf16 sublane packing).
    tile_n = _round_up(min(tile_n, _round_up(n, 16)), 16)
    num_tiles = _cdiv(n, tile_n)
    num_slots = num_slots if num_tiles > 1 else 1
    tps = _cdiv(num_tiles, num_slots)                      # tiles per slot

    # Weights to bf16 (MXU-native, halves weight DMA).  The [mean|log_var] head
    # is fused and lane-block aligned: mean occupies lanes [0, zpad), log_var
    # lanes [zpad, 2*zpad) (zero columns accumulate to zero).
    bf, f32 = jnp.bfloat16, jnp.float32
    zpad = _round_up(z_dim, 128)
    hid = params["w1"].shape[1]
    zcols = jnp.zeros((hid, zpad - z_dim), f32)
    w1 = params["w1"].astype(bf)
    wml = jnp.concatenate([params["wmu"], zcols, params["wlv"], zcols], axis=1).astype(bf)
    bzero = jnp.zeros((1, zpad - z_dim), f32)
    bml = jnp.concatenate([params["bmu"], bzero, params["blv"], bzero], axis=1).astype(f32)
    wd1 = params["wd1"].astype(bf)
    wd2 = params["wd2"].astype(bf)
    b1, bd1, bd2 = params["b1"], params["bd1"], params["bd2"]

    # Streaming tiles: clamp overshoot block indices of the last slot back to
    # the final real tile; those steps are fully masked in-kernel.
    def tile_map(c, i):
        return (jnp.minimum(c * tps + i, num_tiles - 1), 0)
    const_map = lambda c, i: (0, 0)     # weights / biases: VMEM-resident
    out_map = lambda c, i: (0, c)       # one lane-dense accumulator block per slot

    kernel = functools.partial(_losswrap_kernel, n_valid=n, d_latent=z_dim,
                               zpad=zpad, tiles_per_slot=tps)

    # TODO(synk): on v5e, add pipeline_mode=pl.Buffered(3) to the x BlockSpec if
    # profiles show exposed DMA at tile boundaries.
    kl, mse = pl.pallas_call(
        kernel,
        out_shape=(jax.ShapeDtypeStruct((1, num_slots * 128), jnp.float32),
                   jax.ShapeDtypeStruct((1, num_slots * 128), jnp.float32)),
        grid_spec=pltpu.PrefetchScalarGridSpec(
            num_scalar_prefetch=0,
            grid=(num_slots, tps),
            in_specs=[
                pl.BlockSpec((tile_n, d), tile_map),        # x (bf16 stream)
                pl.BlockSpec((tile_n, z_dim), tile_map),    # eps
                pl.BlockSpec(w1.shape, const_map),
                pl.BlockSpec(b1.shape, const_map),
                pl.BlockSpec(wml.shape, const_map),
                pl.BlockSpec(bml.shape, const_map),
                pl.BlockSpec(wd1.shape, const_map),
                pl.BlockSpec(bd1.shape, const_map),
                pl.BlockSpec(wd2.shape, const_map),
                pl.BlockSpec(bd2.shape, const_map),
            ],
            out_specs=(pl.BlockSpec((1, 128), out_map),
                       pl.BlockSpec((1, 128), out_map)),
        ),
        compiler_params=pltpu.CompilerParams(
            # slot axis parallel (sharded across TCs on v7x), batch-tile axis
            # is a reduction into the slot's resident accumulator.
            dimension_semantics=("parallel", "arbitrary"),
            # 48 MiB: safe on v7x (64 MiB VMEM/TC); on v5e/v6e (128 MiB) this
            # also leaves room for tile_n=2048 if desired.
            vmem_limit_bytes=48 * 1024 * 1024),
    )(x_flat, eps, w1, b1, wml, bml, wd1, bd1, wd2, bd2)

    # Combine per-slot partial sums and turn them into means.
    kl_sum = jnp.sum(kl.reshape(num_slots, 128)[:, 0])
    mse_sum = jnp.sum(mse.reshape(num_slots, 128)[:, 0])
    return kl_sum / n, mse_sum / (n * d)


def init_params(key, d_in, d_hidden, d_latent):
    """Deterministic synthetic VAE parameters (Linear-style init, 2-D biases)."""
    ks = jax.random.split(key, 6)

    def lin(k, fan_in, fan_out):
        bound = 1.0 / jnp.sqrt(fan_in)
        return jax.random.uniform(k, (fan_in, fan_out), jnp.float32, -bound, bound)

    return {
        "w1":  lin(ks[0], d_in, d_hidden),     "b1":  jnp.zeros((1, d_hidden), jnp.float32),
        "wmu": lin(ks[1], d_hidden, d_latent), "bmu": jnp.zeros((1, d_latent), jnp.float32),
        "wlv": lin(ks[2], d_hidden, d_latent), "blv": jnp.zeros((1, d_latent), jnp.float32),
        "wd1": lin(ks[3], d_latent, d_hidden), "bd1": jnp.zeros((1, d_hidden), jnp.float32),
        "wd2": lin(ks[4], d_hidden, d_in),     "bd2": jnp.zeros((1, d_in), jnp.float32),
    }


if __name__ == "__main__":
    # Small shapes consistent with an image VAE input: (N, C, H, W) = (2, 4, 16, 16)
    N, C, H, W = 2, 4, 16, 16
    D = C * H * W            # 1024
    HID, Z = 128, 32

    key = jax.random.PRNGKey(0)
    k_x, k_eps, k_p = jax.random.split(key, 3)

    x = jax.random.normal(k_x, (N, C, H, W), jnp.float32)
    eps = jax.random.normal(k_eps, (N, Z), jnp.float32)   # reparameterization noise
    params = init_params(k_p, D, HID, Z)

    kl_loss, mse_loss = jax.jit(losswrap_forward)(x, eps, params)
    jax.block_until_ready((kl_loss, mse_loss))

    # Pure-JAX reference with the same precision choices (bf16-rounded x stream,
    # bf16 matmul inputs, f32 accumulation).
    bf = jnp.bfloat16
    xf_bf = x.reshape(N, -1).astype(bf)
    xf = xf_bf.astype(jnp.float32)
    h = jnp.maximum(jnp.dot(xf_bf, params["w1"].astype(bf),
                            preferred_element_type=jnp.float32) + params["b1"], 0.0)
    mu = jnp.dot(h.astype(bf), params["wmu"].astype(bf),
                 preferred_element_type=jnp.float32) + params["bmu"]
    lv = jnp.dot(h.astype(bf), params["wlv"].astype(bf),
                 preferred_element_type=jnp.float32) + params["blv"]
    s = jnp.exp(0.5 * lv)
    zz = mu + s * eps
    hd = jnp.maximum(jnp.dot(zz.astype(bf), params["wd1"].astype(bf),
                             preferred_element_type=jnp.float32) + params["bd1"], 0.0)
    xh = jnp.dot(hd.astype(bf), params["wd2"].astype(bf),
                 preferred_element_type=jnp.float32) + params["bd2"]
    kl_ref = jnp.mean(-0.5 * jnp.sum(1.0 + lv - mu * mu - s * s, axis=-1))
    mse_ref = jnp.mean((xf - xh) ** 2)

    assert jnp.allclose(kl_loss, kl_ref, rtol=2e-2, atol=2e-2), (kl_loss, kl_ref)
    assert jnp.allclose(mse_loss, mse_ref, rtol=2e-2, atol=2e-2), (mse_loss, mse_ref)

    print("KERNEL_OK")
</pallas_src>

<mosaic_0001>
module attributes {stable_mosaic.version = 11 : i64} {
  func.func @_losswrap_kernel(%arg0: i32, %arg1: i32, %arg2: memref<16x1024xbf16, #tpu.memory_space<vmem>>, %arg3: memref<16x32xf32, #tpu.memory_space<vmem>>, %arg4: memref<1024x128xbf16, #tpu.memory_space<vmem>>, %arg5: memref<1x128xf32, #tpu.memory_space<vmem>>, %arg6: memref<128x256xbf16, #tpu.memory_space<vmem>>, %arg7: memref<1x256xf32, #tpu.memory_space<vmem>>, %arg8: memref<32x128xbf16, #tpu.memory_space<vmem>>, %arg9: memref<1x128xf32, #tpu.memory_space<vmem>>, %arg10: memref<128x1024xbf16, #tpu.memory_space<vmem>>, %arg11: memref<1x1024xf32, #tpu.memory_space<vmem>>, %arg12: memref<1x128xf32, #tpu.memory_space<vmem>>, %arg13: memref<1x128xf32, #tpu.memory_space<vmem>>) attributes {dimension_semantics = [#tpu.dimension_semantics<parallel>, #tpu.dimension_semantics<arbitrary>], iteration_bounds = array<i64: 1, 1>, scalar_prefetch = 0 : i64, scratch_operands = 0 : i64, tpu.core_type = #tpu.core_type<tc>, window_params = [{transform_indices = @transform_0, window_bounds = array<i64: 16, 1024>}, {transform_indices = @transform_1, window_bounds = array<i64: 16, 32>}, {pipeline_mode = #tpu.pipeline_mode<synchronous>, transform_indices = @transform_2, window_bounds = array<i64: 1024, 128>}, {pipeline_mode = #tpu.pipeline_mode<synchronous>, transform_indices = @transform_3, window_bounds = array<i64: 1, 128>}, {pipeline_mode = #tpu.pipeline_mode<synchronous>, transform_indices = @transform_4, window_bounds = array<i64: 128, 256>}, {pipeline_mode = #tpu.pipeline_mode<synchronous>, transform_indices = @transform_5, window_bounds = array<i64: 1, 256>}, {pipeline_mode = #tpu.pipeline_mode<synchronous>, transform_indices = @transform_6, window_bounds = array<i64: 32, 128>}, {pipeline_mode = #tpu.pipeline_mode<synchronous>, transform_indices = @transform_7, window_bounds = array<i64: 1, 128>}, {pipeline_mode = #tpu.pipeline_mode<synchronous>, transform_indices = @transform_8, window_bounds = array<i64: 128, 1024>}, {pipeline_mode = #tpu.pipeline_mode<synchronous>, transform_indices = @transform_9, window_bounds = array<i64: 1, 1024>}, {transform_indices = @transform_10, window_bounds = array<i64: 1, 128>}, {transform_indices = @transform_11, window_bounds = array<i64: 1, 128>}]} {
    %c0_i32 = arith.constant 0 : i32
    %0 = arith.cmpi eq, %arg1, %c0_i32 : i32
    %1 = arith.extui %0 : i1 to i32
    %c0_i32_0 = arith.constant 0 : i32
    %2 = arith.cmpi ne, %1, %c0_i32_0 : i32
    scf.if %2 {
      %cst_44 = arith.constant 0.000000e+00 : f32
      %86 = vector.broadcast %cst_44 : f32 to vector<1x128xf32>
      %c0_45 = arith.constant 0 : index
      %c0_46 = arith.constant 0 : index
      %87 = vector.load %arg12[%c0_45, %c0_46] : memref<1x128xf32, #tpu.memory_space<vmem>>, vector<1x128xf32>
      tpu.vector_store %arg12[%c0_45, %c0_46], %86 {strides = array<i32>} : memref<1x128xf32, #tpu.memory_space<vmem>>, vector<1x128xf32>,
      %cst_47 = arith.constant 0.000000e+00 : f32
      %88 = vector.broadcast %cst_47 : f32 to vector<1x128xf32>
      %c0_48 = arith.constant 0 : index
      %c0_49 = arith.constant 0 : index
      %89 = vector.load %arg13[%c0_48, %c0_49] : memref<1x128xf32, #tpu.memory_space<vmem>>, vector<1x128xf32>
      tpu.vector_store %arg13[%c0_48, %c0_49], %88 {strides = array<i32>} : memref<1x128xf32, #tpu.memory_space<vmem>>, vector<1x128xf32>,
    } else {
    }
    %c0 = arith.constant 0 : index
    %c0_1 = arith.constant 0 : index
    %3 = vector.load %arg2[%c0, %c0_1] : memref<16x1024xbf16, #tpu.memory_space<vmem>>, vector<16x1024xbf16>
    %c0_2 = arith.constant 0 : index
    %c0_3 = arith.constant 0 : index
    %4 = vector.load %arg3[%c0_2, %c0_3] : memref<16x32xf32, #tpu.memory_space<vmem>>, vector<16x32xf32>
    %c1_i32 = arith.constant 1 : i32
    %5 = arith.muli %arg0, %c1_i32 : i32
    %6 = arith.addi %5, %arg1 : i32
    %c16_i32 = arith.constant 16 : i32
    %7 = arith.muli %6, %c16_i32 : i32
    %8 = tpu.iota {dimensions = array<i32: 0>} : vector<16x1xi32>
    %9 = vector.broadcast %7 : i32 to vector<16x1xi32>
    %10 = arith.addi %9, %8 : vector<16x1xi32>
    %c2_i32 = arith.constant 2 : i32
    %11 = vector.broadcast %c2_i32 : i32 to vector<16x1xi32>
    %12 = arith.cmpi slt, %10, %11 : vector<16x1xi32>
    %cst = arith.constant 0.000000e+00 : bf16
    %13 = vector.broadcast %cst : bf16 to vector<16x1024xbf16>
    %14 = vector.shape_cast %12 : vector<16x1xi1> to vector<16x1xi1>
    %15 = vector.broadcast %14 : vector<16x1xi1> to vector<16x1024xi1>
    %16 = arith.select %15, %3, %13 : vector<16x1024xi1>, vector<16x1024xbf16>
    %cst_4 = arith.constant 0.000000e+00 : f32
    %17 = vector.broadcast %cst_4 : f32 to vector<16x32xf32>
    %18 = vector.shape_cast %12 : vector<16x1xi1> to vector<16x1xi1>
    %19 = vector.broadcast %18 : vector<16x1xi1> to vector<16x32xi1>
    %20 = arith.select %19, %4, %17 : vector<16x32xi1>, vector<16x32xf32>
    %c0_5 = arith.constant 0 : index
    %c0_6 = arith.constant 0 : index
    %21 = vector.load %arg4[%c0_5, %c0_6] : memref<1024x128xbf16, #tpu.memory_space<vmem>>, vector<1024x128xbf16>
    %cst_7 = arith.constant dense<0.000000e+00> : vector<16x128xf32>
    %22 = tpu.matmul %16, %21, %cst_7 {dimension_numbers = #tpu.dot_dimension_numbers<[1], [0], [0], [1], [0, 0, 1, 1], [], []>} : vector<16x1024xbf16>, vector<1024x128xbf16>, vector<16x128xf32> -> vector<16x128xf32>
    %c0_8 = arith.constant 0 : index
    %c0_9 = arith.constant 0 : index
    %23 = vector.load %arg5[%c0_8, %c0_9] : memref<1x128xf32, #tpu.memory_space<vmem>>, vector<1x128xf32>
    %24 = vector.broadcast %23 : vector<1x128xf32> to vector<16x128xf32>
    %25 = arith.addf %22, %24 : vector<16x128xf32>
    %cst_10 = arith.constant 0.000000e+00 : f32
    %26 = vector.broadcast %cst_10 : f32 to vector<16x128xf32>
    %27 = arith.maximumf %25, %26 : vector<16x128xf32>
    %28 = arith.truncf %27 : vector<16x128xf32> to vector<16x128xbf16>
    %c0_11 = arith.constant 0 : index
    %c0_12 = arith.constant 0 : index
    %29 = vector.load %arg6[%c0_11, %c0_12] : memref<128x256xbf16, #tpu.memory_space<vmem>>, vector<128x256xbf16>
    %cst_13 = arith.constant dense<0.000000e+00> : vector<16x256xf32>
    %30 = tpu.matmul %28, %29, %cst_13 {dimension_numbers = #tpu.dot_dimension_numbers<[1], [0], [0], [1], [0, 0, 1, 1], [], []>} : vector<16x128xbf16>, vector<128x256xbf16>, vector<16x256xf32> -> vector<16x256xf32>
    %c0_14 = arith.constant 0 : index
    %c0_15 = arith.constant 0 : index
    %31 = vector.load %arg7[%c0_14, %c0_15] : memref<1x256xf32, #tpu.memory_space<vmem>>, vector<1x256xf32>
    %32 = vector.broadcast %31 : vector<1x256xf32> to vector<16x256xf32>
    %33 = arith.addf %30, %32 : vector<16x256xf32>
    %34 = vector.extract_strided_slice %33 {offsets = [0, 0], sizes = [16, 32], strides = [1, 1]} : vector<16x256xf32> to vector<16x32xf32>
    %35 = vector.extract_strided_slice %33 {offsets = [0, 128], sizes = [16, 32], strides = [1, 1]} : vector<16x256xf32> to vector<16x32xf32>
    %cst_16 = arith.constant 5.000000e-01 : f32
    %36 = vector.broadcast %cst_16 : f32 to vector<16x32xf32>
    %37 = arith.mulf %36, %35 : vector<16x32xf32>
    %38 = math.exp %37 : vector<16x32xf32>
    %39 = arith.mulf %38, %20 : vector<16x32xf32>
    %40 = arith.addf %34, %39 : vector<16x32xf32>
    %41 = arith.truncf %40 : vector<16x32xf32> to vector<16x32xbf16>
    %c0_17 = arith.constant 0 : index
    %c0_18 = arith.constant 0 : index
    %42 = vector.load %arg8[%c0_17, %c0_18] : memref<32x128xbf16, #tpu.memory_space<vmem>>, vector<32x128xbf16>
    %cst_19 = arith.constant dense<0.000000e+00> : vector<16x128xf32>
    %43 = tpu.matmul %41, %42, %cst_19 {dimension_numbers = #tpu.dot_dimension_numbers<[1], [0], [0], [1], [0, 0, 1, 1], [], []>} : vector<16x32xbf16>, vector<32x128xbf16>, vector<16x128xf32> -> vector<16x128xf32>
    %c0_20 = arith.constant 0 : index
    %c0_21 = arith.constant 0 : index
    %44 = vector.load %arg9[%c0_20, %c0_21] : memref<1x128xf32, #tpu.memory_space<vmem>>, vector<1x128xf32>
    %45 = vector.broadcast %44 : vector<1x128xf32> to vector<16x128xf32>
    %46 = arith.addf %43, %45 : vector<16x128xf32>
    %cst_22 = arith.constant 0.000000e+00 : f32
    %47 = vector.broadcast %cst_22 : f32 to vector<16x128xf32>
    %48 = arith.maximumf %46, %47 : vector<16x128xf32>
    %49 = arith.truncf %48 : vector<16x128xf32> to vector<16x128xbf16>
    %c0_23 = arith.constant 0 : index
    %c0_24 = arith.constant 0 : index
    %50 = vector.load %arg10[%c0_23, %c0_24] : memref<128x1024xbf16, #tpu.memory_space<vmem>>, vector<128x1024xbf16>
    %cst_25 = arith.constant dense<0.000000e+00> : vector<16x1024xf32>
    %51 = tpu.matmul %49, %50, %cst_25 {dimension_numbers = #tpu.dot_dimension_numbers<[1], [0], [0], [1], [0, 0, 1, 1], [], []>} : vector<16x128xbf16>, vector<128x1024xbf16>, vector<16x1024xf32> -> vector<16x1024xf32>
    %c0_26 = arith.constant 0 : index
    %c0_27 = arith.constant 0 : index
    %52 = vector.load %arg11[%c0_26, %c0_27] : memref<1x1024xf32, #tpu.memory_space<vmem>>, vector<1x1024xf32>
    %53 = vector.broadcast %52 : vector<1x1024xf32> to vector<16x1024xf32>
    %54 = arith.addf %51, %53 : vector<16x1024xf32>
    %cst_28 = arith.constant 1.000000e+00 : f32
    %55 = vector.broadcast %cst_28 : f32 to vector<16x32xf32>
    %56 = arith.addf %55, %35 : vector<16x32xf32>
    %57 = arith.mulf %34, %34 : vector<16x32xf32>
    %58 = arith.subf %56, %57 : vector<16x32xf32>
    %59 = arith.mulf %38, %38 : vector<16x32xf32>
    %60 = arith.subf %58, %59 : vector<16x32xf32>
    %cst_29 = arith.constant dense<0.000000e+00> : vector<16xf32>
    %61 = vector.multi_reduction <add>, %60, %cst_29 [1] : vector<16x32xf32> to vector<16xf32>
    %62 = vector.shape_cast %61 : vector<16xf32> to vector<16x1xf32>
    %cst_30 = arith.constant -5.000000e-01 : f32
    %63 = vector.broadcast %cst_30 : f32 to vector<16x1xf32>
    %64 = arith.mulf %63, %62 : vector<16x1xf32>
    %cst_31 = arith.constant 0.000000e+00 : f32
    %65 = vector.broadcast %cst_31 : f32 to vector<16x1xf32>
    %66 = arith.select %12, %64, %65 : vector<16x1xi1>, vector<16x1xf32>
    %cst_32 = arith.constant dense<0.000000e+00> : vector<1xf32>
    %67 = vector.multi_reduction <add>, %66, %cst_32 [0] : vector<16x1xf32> to vector<1xf32>
    %68 = vector.shape_cast %67 : vector<1xf32> to vector<1x1xf32>
    %c0_33 = arith.constant 0 : index
    %c0_34 = arith.constant 0 : index
    %69 = vector.load %arg12[%c0_33, %c0_34] : memref<1x128xf32, #tpu.memory_space<vmem>>, vector<1x128xf32>
    %70 = vector.broadcast %68 : vector<1x1xf32> to vector<1x128xf32>
    %71 = arith.addf %69, %70 : vector<1x128xf32>
    %c0_35 = arith.constant 0 : index
    %c0_36 = arith.constant 0 : index
    %72 = vector.load %arg12[%c0_35, %c0_36] : memref<1x128xf32, #tpu.memory_space<vmem>>, vector<1x128xf32>
    tpu.vector_store %arg12[%c0_35, %c0_36], %71 {strides = array<i32>} : memref<1x128xf32, #tpu.memory_space<vmem>>, vector<1x128xf32>,
    %73 = arith.extf %16 : vector<16x1024xbf16> to vector<16x1024xf32>
    %74 = arith.subf %73, %54 : vector<16x1024xf32>
    %75 = arith.mulf %74, %74 : vector<16x1024xf32>
    %cst_37 = arith.constant dense<0.000000e+00> : vector<16xf32>
    %76 = vector.multi_reduction <add>, %75, %cst_37 [1] : vector<16x1024xf32> to vector<16xf32>
    %77 = vector.shape_cast %76 : vector<16xf32> to vector<16x1xf32>
    %cst_38 = arith.constant 0.000000e+00 : f32
    %78 = vector.broadcast %cst_38 : f32 to vector<16x1xf32>
    %79 = arith.select %12, %77, %78 : vector<16x1xi1>, vector<16x1xf32>
    %cst_39 = arith.constant dense<0.000000e+00> : vector<1xf32>
    %80 = vector.multi_reduction <add>, %79, %cst_39 [0] : vector<16x1xf32> to vector<1xf32>
    %81 = vector.shape_cast %80 : vector<1xf32> to vector<1x1xf32>
    %c0_40 = arith.constant 0 : index
    %c0_41 = arith.constant 0 : index
    %82 = vector.load %arg13[%c0_40, %c0_41] : memref<1x128xf32, #tpu.memory_space<vmem>>, vector<1x128xf32>
    %83 = vector.broadcast %81 : vector<1x1xf32> to vector<1x128xf32>
    %84 = arith.addf %82, %83 : vector<1x128xf32>
    %c0_42 = arith.constant 0 : index
    %c0_43 = arith.constant 0 : index
    %85 = vector.load %arg13[%c0_42, %c0_43] : memref<1x128xf32, #tpu.memory_space<vmem>>, vector<1x128xf32>
    tpu.vector_store %arg13[%c0_42, %c0_43], %84 {strides = array<i32>} : memref<1x128xf32, #tpu.memory_space<vmem>>, vector<1x128xf32>,
    return
  }
  func.func @transform_0(%arg0: i32, %arg1: i32) -> (i32, i32) {
    %c1_i32 = arith.constant 1 : i32
    %0 = arith.muli %arg0, %c1_i32 : i32
    %1 = arith.addi %0, %arg1 : i32
    %c0_i32 = arith.constant 0 : i32
    %2 = arith.minsi %1, %c0_i32 : i32
    %c0_i32_0 = arith.constant 0 : i32
    %c0_i32_1 = arith.constant 0 : i32
    return %2, %c0_i32_0 : i32, i32
  }
  func.func @transform_1(%arg0: i32, %arg1: i32) -> (i32, i32) {
    %c1_i32 = arith.constant 1 : i32
    %0 = arith.muli %arg0, %c1_i32 : i32
    %1 = arith.addi %0, %arg1 : i32
    %c0_i32 = arith.constant 0 : i32
    %2 = arith.minsi %1, %c0_i32 : i32
    %c0_i32_0 = arith.constant 0 : i32
    %c0_i32_1 = arith.constant 0 : i32
    return %2, %c0_i32_0 : i32, i32
  }
  func.func @transform_2(%arg0: i32, %arg1: i32) -> (i32, i32) {
    %c0_i32 = arith.constant 0 : i32
    %c0_i32_0 = arith.constant 0 : i32
    %c0_i32_1 = arith.constant 0 : i32
    return %c0_i32, %c0_i32_0 : i32, i32
  }
  func.func @transform_3(%arg0: i32, %arg1: i32) -> (i32, i32) {
    %c0_i32 = arith.constant 0 : i32
    %c0_i32_0 = arith.constant 0 : i32
    %c0_i32_1 = arith.constant 0 : i32
    return %c0_i32, %c0_i32_0 : i32, i32
  }
  func.func @transform_4(%arg0: i32, %arg1: i32) -> (i32, i32) {
    %c0_i32 = arith.constant 0 : i32
    %c0_i32_0 = arith.constant 0 : i32
    %c0_i32_1 = arith.constant 0 : i32
    return %c0_i32, %c0_i32_0 : i32, i32
  }
  func.func @transform_5(%arg0: i32, %arg1: i32) -> (i32, i32) {
    %c0_i32 = arith.constant 0 : i32
    %c0_i32_0 = arith.constant 0 : i32
    %c0_i32_1 = arith.constant 0 : i32
    return %c0_i32, %c0_i32_0 : i32, i32
  }
  func.func @transform_6(%arg0: i32, %arg1: i32) -> (i32, i32) {
    %c0_i32 = arith.constant 0 : i32
    %c0_i32_0 = arith.constant 0 : i32
    %c0_i32_1 = arith.constant 0 : i32
    return %c0_i32, %c0_i32_0 : i32, i32
  }
  func.func @transform_7(%arg0: i32, %arg1: i32) -> (i32, i32) {
    %c0_i32 = arith.constant 0 : i32
    %c0_i32_0 = arith.constant 0 : i32
    %c0_i32_1 = arith.constant 0 : i32
    return %c0_i32, %c0_i32_0 : i32, i32
  }
  func.func @transform_8(%arg0: i32, %arg1: i32) -> (i32, i32) {
    %c0_i32 = arith.constant 0 : i32
    %c0_i32_0 = arith.constant 0 : i32
    %c0_i32_1 = arith.constant 0 : i32
    return %c0_i32, %c0_i32_0 : i32, i32
  }
  func.func @transform_9(%arg0: i32, %arg1: i32) -> (i32, i32) {
    %c0_i32 = arith.constant 0 : i32
    %c0_i32_0 = arith.constant 0 : i32
    %c0_i32_1 = arith.constant 0 : i32
    return %c0_i32, %c0_i32_0 : i32, i32
  }
  func.func @transform_10(%arg0: i32, %arg1: i32) -> (i32, i32) {
    %c0_i32 = arith.constant 0 : i32
    %c0_i32_0 = arith.constant 0 : i32
    return %c0_i32, %arg0 : i32, i32
  }
  func.func @transform_11(%arg0: i32, %arg1: i32) -> (i32, i32) {
    %c0_i32 = arith.constant 0 : i32
    %c0_i32_0 = arith.constant 0 : i32
    return %c0_i32, %arg0 : i32, i32
  }
}

</mosaic_0001>

<bundles_post_ra>
// kernel: losswrap_forward.1
= control target key start
LH: loop header
LB: loop body
LE: loop exit
PB: predicated region body
PF: predicated region fallthrough
CT: control target
= control target key end

     0   :  { %v141_v0 = vlaneseq  ;;  %v2711_v4 = vmov 269488144   ;;  %v2712_v6 = vmov 842150450   ;;  %v2713_v10 = vmov 1414812756   ;;  %s3766_s2 = inlined_call_operand.vmem [shape: bf16[1024,128], index: 2, kind: input, shape index: {}]   ;;  %s3767_s0 = inlined_call_operand.vmem [shape: bf16[2,1024], index: 0, kind: input, shape index: {}]   ;;  %s3768_s3 = inlined_call_operand.vmem [shape: f32[1,128], index: 3, kind: input, shape index: {}]   ;;  %s3769_s4 = inlined_call_operand.vmem [shape: bf16[128,256], index: 4, kind: input, shape index: {}]   ;;  %s3770_s6 = inlined_call_operand.vmem [shape: bf16[32,128], index: 6, kind: input, shape index: {}]   ;;  %s3771_s5 = inlined_call_operand.vmem [shape: f32[1,256], index: 5, kind: input, shape index: {}]   ;;  %s3772_s8 = inlined_call_operand.vmem [shape: bf16[128,1024], index: 8, kind: input, shape index: {}]   ;;  %s3773_s10 = inlined_call_operand.vmem [shape: f32[1,128], index: 10, kind: output, shape index: {0}]   ;;  %s3774_s1 = inlined_call_operand.vmem [shape: f32[2,32], index: 1, kind: input, shape index: {}]   ;;  %s3775_s7 = inlined_call_operand.vmem [shape: f32[1,128], index: 7, kind: input, shape index: {}]   ;;  %s3776_s11 = inlined_call_operand.vmem [shape: f32[1,128], index: 11, kind: output, shape index: {1}]   ;;  %s3777_s9 = inlined_call_operand.vmem [shape: f32[1,1024], index: 9, kind: input, shape index: {}]  }
   0x1   :  { %v2560_v1 = vld [vmem:[%s3766_s2 + $0x38] sm:$0xff]  ;;  %v156_v5 = vunpack.c.l.s4 %v2711_v4  ;;  %v160_v7 = vunpack.c.l.s4 %v2712_v6  ;;  %v164_v11 = vunpack.c.l.s4 %v2713_v10  ;;  %v2559_v12 = vld [vmem:[%s3766_s2 + $0x30] sm:$0xff]  ;;  %v2714_v16 = vmov 1987475062   ;;  %v2558_v30 = vld [vmem:[%s3766_s2 + $0x28] sm:$0xff] }
   0x2   :  { %v2568_v2 = vld [vmem:[%s3766_s2 + $0x78] sm:$0xff]  ;;  %v2789_v9 = vshrl.u32 %v141_v0, 7  ;;  %832 = vmatpush.bf16.msra.mxu0 %v2560_v1  ;;  %v2567_v13 = vld [vmem:[%s3766_s2 + $0x70] sm:$0xff]  ;;  %v168_v17 = vunpack.c.l.s4 %v2714_v16  ;;  %v2715_v21 = vmov 0   ;;  %v2566_v31 = vld [vmem:[%s3766_s2 + $0x68] sm:$0xff] }
   0x3   :  { %v2576_v3 = vld [vmem:[%s3766_s2 + $0xb8] sm:$0xff]  ;;  %846 = vmatpush.bf16.msra.mxu1 %v2568_v2  ;;  %v157_v14 = vunpack.c.0.s8 %v156_v5  ;;  %v161_v15 = vunpack.c.0.s8 %v160_v7  ;;  %v2575_v18 = vld [vmem:[%s3766_s2 + $0xb0] sm:$0xff]  ;;  %v165_v20 = vunpack.c.0.s8 %v164_v11  ;;  %v2574_v34 = vld [vmem:[%s3766_s2 + $0xa8] sm:$0xff]  ;;  %v2818_v36 = vunpack.c.l.b16 %v2715_v21 }
   0x4   :  { %v2584_v8 = vld [vmem:[%s3766_s2 + $0xf8] sm:$0xff]  ;;  %860 = vmatpush.bf16.msra.mxu2 %v2576_v3  ;;  %v2583_v19 = vld [vmem:[%s3766_s2 + $0xf0] sm:$0xff]  ;;  %vm147_vm0 = vcmp.lt.s32.totalorder %v2789_v9, 2  ;;  %v169_v23 = vunpack.c.0.s8 %v168_v17  ;;  %v2582_v35 = vld [vmem:[%s3766_s2 + $0xe8] sm:$0xff]  ;;  %v2820_v37 = vunpack.c.h.b16 %v2715_v21 }
   0x5   :  { %874 = vmatpush.bf16.msra.mxu3 %v2584_v8  ;;  %v153_v22 = vsel %vm147_vm0, 1, %v2715_v21  ;;  %v174_v24 = vperm.slane %v2715_v21, %v157_v14  ;;  %v178_v25 = vperm.slane %v2715_v21, %v161_v15  ;;  %v182_v29 = vperm.slane %v2715_v21, %v165_v20  ;;  %v2557_v41 = vld [vmem:[%s3766_s2 + $0x20] sm:$0xff]  ;;  %v2556_v57 = vld [vmem:[%s3766_s2 + $0x18] sm:$0xff]  ;;  %v130_v1 = vld [vmem:[%s3767_s0 + $0x8] sm:$0xff] }
   0x6   :  { %v158_v26 = vperm.slane %v153_v22, %v157_v14  ;;  %v162_v27 = vperm.slane %v153_v22, %v161_v15  ;;  %v166_v28 = vperm.slane %v153_v22, %v165_v20  ;;  %833 = vmatpush.bf16.msra.mxu0 %v2559_v12  ;;  %v170_v32 = vperm.slane %v153_v22, %v169_v23  ;;  %v2565_v42 = vld [vmem:[%s3766_s2 + $0x60] sm:$0xff]  ;;  %v2564_v58 = vld [vmem:[%s3766_s2 + $0x58] sm:$0xff]  ;;  %v2555_v5 = vld [vmem:[%s3766_s2 + $0x10] sm:$0xff] }
   0x7   :  { %847 = vmatpush.bf16.msra.mxu1 %v2567_v13  ;;  %v186_v33 = vperm.slane %v2715_v21, %v169_v23  ;;  %vm191_vm4 = vcmp.ne.s32.totalorder %v174_v24, 0  ;;  %vm192_vm6 = vcmp.ne.s32.totalorder %v178_v25, 0  ;;  %vm193_vm7 = vcmp.ne.s32.totalorder %v182_v29, 0  ;;  %v2573_v46 = vld [vmem:[%s3766_s2 + $0xa0] sm:$0xff]  ;;  %v2572_v59 = vld [vmem:[%s3766_s2 + $0x98] sm:$0xff]  ;;  %v131_v6 = vld [vmem:[%s3767_s0 + $0x10] sm:$0xff] }
   0x8   :  { %861 = vmatpush.bf16.msra.mxu2 %v2575_v18  ;;  %vm187_vm1 = vcmp.ne.s32.totalorder %v158_v26, 0  ;;  %vm188_vm2 = vcmp.ne.s32.totalorder %v162_v27, 0  ;;  %vm189_vm3 = vcmp.ne.s32.totalorder %v166_v28, 0  ;;  %vm190_vm5 = vcmp.ne.s32.totalorder %v170_v32, 0  ;;  %v2581_v47 = vld [vmem:[%s3766_s2 + $0xe0] sm:$0xff]  ;;  %v2580_v63 = vld [vmem:[%s3766_s2 + $0xd8] sm:$0xff] }
   0x9   :  { %875 = vmatpush.bf16.msra.mxu3 %v2583_v19  ;;  %v195_v38 = vsel %vm187_vm1, 1, %v2715_v21  ;;  %v196_v39 = vsel %vm188_vm2, 1, %v2715_v21  ;;  %v197_v40 = vsel %vm189_vm3, 1, %v2715_v21  ;;  %vm194_vm8 = vcmp.ne.s32.totalorder %v186_v33, 0  ;;  %v129_v0 = vld [vmem:[%s3767_s0] sm:$0xff]  ;;  %v2563_v11 = vld [vmem:[%s3766_s2 + $0x50] sm:$0xff] }
   0xa   :  { %834 = vmatpush.bf16.msra.mxu0 %v2558_v30  ;;  %v198_v43 = vsel %vm190_vm5, 1, %v2715_v21  ;;  %v199_v44 = vsel %vm191_vm4, 1, %v2715_v21  ;;  %v1952_v45 = vunpack.i.l.s16 %v195_v38  ;;  %v200_v48 = vsel %vm192_vm6, 1, %v2715_v21  ;;  %v132_v12 = vld [vmem:[%s3767_s0 + $0x18] sm:$0xff]  ;;  %v2571_v15 = vld [vmem:[%s3766_s2 + $0x90] sm:$0xff]  ;;  %v133_v16 = vld [vmem:[%s3767_s0 + $0x20] sm:$0xff] }
   0xb   :  { %848 = vmatpush.bf16.msra.mxu1 %v2566_v31  ;;  %v1954_v49 = vunpack.i.l.s16 %v196_v39  ;;  %v1956_v50 = vunpack.i.l.s16 %v197_v40  ;;  %v201_v51 = vsel %vm193_vm7, 1, %v2715_v21  ;;  %v1958_v52 = vunpack.i.l.s16 %v198_v43  ;;  %v134_v22 = vld [vmem:[%s3767_s0 + $0x28] sm:$0xff]  ;;  %v135_v26 = vld [vmem:[%s3767_s0 + $0x30] sm:$0xff]  ;;  %v136_v30 = vld [vmem:[%s3767_s0 + $0x38] sm:$0xff] }
   0xc   :  { %862 = vmatpush.bf16.msra.mxu2 %v2574_v34  ;;  %v202_v53 = vsel %vm194_vm8, 1, %v2715_v21  ;;  %vm2837_vm9 = vcmp.ne.s32.totalorder %v1952_v45, %v2818_v36  ;;  %vm2842_vm10 = vcmp.ne.s32.totalorder %v1952_v45, %v2820_v37  ;;  %v1960_v56 = vunpack.i.l.s16 %v199_v44  ;;  %v2579_v21 = vld [vmem:[%s3766_s2 + $0xd0] sm:$0xff]  ;;  %v2554_v32 = vld [vmem:[%s3766_s2 + $0x8] sm:$0xff]  ;;  %v2553_v39 = vld [vmem:[%s3766_s2] sm:$0xff] }
   0xd   :  { %876 = vmatpush.bf16.msra.mxu3 %v2582_v35  ;;  %vm2856_vm11 = vcmp.ne.s32.totalorder %v1954_v49, %v2818_v36  ;;  %vm2861_vm12 = vcmp.ne.s32.totalorder %v1954_v49, %v2820_v37  ;;  %v1962_v62 = vunpack.i.l.s16 %v200_v48  ;;  %vm2875_vm13 = vcmp.ne.s32.totalorder %v1956_v50, %v2818_v36  ;;  %vm217_vm15 = vmpackc.low %vm2842_vm10, %vm2837_vm9  ;;  %v2562_v33 = vld [vmem:[%s3766_s2 + $0x48] sm:$0xff]  ;;  %v2561_v40 = vld [vmem:[%s3766_s2 + $0x40] sm:$0xff] }
   0xe   :  { %835 = vmatpush.bf16.msra.mxu0 %v2557_v41  ;;  %vm2880_vm14 = vcmp.ne.s32.totalorder %v1956_v50, %v2820_v37  ;;  %v1964_v4 = vunpack.i.l.s16 %v201_v51  ;;  %vm2895_vm1 = vcmp.ne.s32.totalorder %v1958_v52, %v2818_v36  ;;  %vm2900_vm2 = vcmp.ne.s32.totalorder %v1958_v52, %v2820_v37  ;;  %vm224_vm3 = vmpackc.low %vm2861_vm12, %vm2856_vm11  ;;  %v2570_v35 = vld [vmem:[%s3766_s2 + $0x88] sm:$0xff]  ;;  %v2569_v41 = vld [vmem:[%s3766_s2 + $0x80] sm:$0xff] }
   0xf   :  { %849 = vmatpush.bf16.msra.mxu1 %v2565_v42  ;;  %v1966_v10 = vunpack.i.l.s16 %v202_v53  ;;  %vm2915_vm4 = vcmp.ne.s32.totalorder %v1960_v56, %v2818_v36  ;;  %vm2920_vm5 = vcmp.ne.s32.totalorder %v1960_v56, %v2820_v37  ;;  %vm231_vm6 = vmpackc.low %vm2880_vm14, %vm2875_vm13  ;;  %vm2935_vm7 = vcmp.ne.s32.totalorder %v1962_v62, %v2818_v36  ;;  %v2577_v42 = vld [vmem:[%s3766_s2 + $0xc0] sm:$0xff]  ;;  %v2592_v43 = vld [vmem:[%s3766_s2 + $0x138] sm:$0xff] }
  0x10   :  { %863 = vmatpush.bf16.msra.mxu2 %v2573_v46  ;;  %vm2940_vm8 = vcmp.ne.s32.totalorder %v1962_v62, %v2820_v37  ;;  %v2949_v19 = vsel %vm217_vm15, %v129_v0, 0  ;;  %v2951_v20 = vsel %vm224_vm3, %v130_v1, 0  ;;  %vm238_vm11 = vmpackc.low %vm2900_vm2, %vm2895_vm1  ;;  %vm2964_vm9 = vcmp.ne.s32.totalorder %v1964_v4, %v2818_v36  ;;  %v2600_v44 = vld [vmem:[%s3766_s2 + $0x178] sm:$0xff]  ;;  %v2599_v48 = vld [vmem:[%s3766_s2 + $0x170] sm:$0xff] }
  0x11   :  { %877 = vmatpush.bf16.msra.mxu3 %v2581_v47  ;;  %vm2969_vm10 = vcmp.ne.s32.totalorder %v1964_v4, %v2820_v37  ;;  %v2973_v25 = vsel %vm231_vm6, %v131_v6, 0  ;;  %410 = vst [vmem:[#allocation1] ss:$9 sm:$0xff] %v2949_v19  ;;  %vm245_vm12 = vmpackc.low %vm2920_vm5, %vm2915_vm4  ;;  %vm2984_vm13 = vcmp.ne.s32.totalorder %v1966_v10, %v2818_v36  ;;  %vm2989_vm14 = vcmp.ne.s32.totalorder %v1966_v10, %v2820_v37  ;;  %v2578_v36 = vld [vmem:[%s3766_s2 + $0xc8] sm:$0xff]  ;;  %v2608_v45 = vld [vmem:[%s3766_s2 + $0x1b8] sm:$0xff] }
  0x12   :  { %836 = vmatpush.bf16.msra.mxu0 %v2556_v57  ;;  %v2993_v29 = vsel %vm238_vm11, %v132_v12, 0  ;;  %413 = vst [vmem:[#allocation1 + $0x1] ss:$9 sm:$0xff] %v2951_v20  ;;  %vm252_vm15 = vmpackc.low %vm2940_vm8, %vm2935_vm7  ;;  %v3003_v31 = vsel %vm245_vm12, %v133_v16, 0  ;;  %v2616_v46 = vld [vmem:[%s3766_s2 + $0x1f8] sm:$0xff]  ;;  %v2591_v47 = vld [vmem:[%s3766_s2 + $0x130] sm:$0xff] }
  0x13   :  { %850 = vmatpush.bf16.msra.mxu1 %v2564_v58  ;;  %416 = vst [vmem:[#allocation1 + $0x2] ss:$9 sm:$0xff] %v2973_v25  ;;  %vm259_vm1 = vmpackc.low %vm2969_vm10, %vm2964_vm9  ;;  %v3016_v34 = vsel %vm252_vm15, %v134_v22, 0  ;;  %v2607_v49 = vld [vmem:[%s3766_s2 + $0x1b0] sm:$0xff]  ;;  %v2590_v55 = vld [vmem:[%s3766_s2 + $0x128] sm:$0xff]  ;;  %vm1108_vm3 = vcmask 261120  }
  0x14   :  { %864 = vmatpush.bf16.msra.mxu2 %v2572_v59  ;;  %419 = vst [vmem:[#allocation1 + $0x3] ss:$9 sm:$0xff] %v2993_v29  ;;  %vm266_vm2 = vmpackc.low %vm2989_vm14, %vm2984_vm13  ;;  %v3029_v37 = vsel %vm259_vm1, %v135_v26, 0  ;;  %v2615_v50 = vld [vmem:[%s3766_s2 + $0x1f0] sm:$0xff]  ;;  %v2598_v56 = vld [vmem:[%s3766_s2 + $0x168] sm:$0xff]  ;;  %vm1717_vm4 = vcmask 1041408  }
  0x15   :  { %878 = vmatpush.bf16.msra.mxu3 %v2580_v63  ;;  %422 = vst [vmem:[#allocation1 + $0x4] ss:$9 sm:$0xff] %v3003_v31  ;;  %v3032_v38 = vsel %vm266_vm2, %v136_v30, 0  ;;  %v2606_v57 = vld [vmem:[%s3766_s2 + $0x1a8] sm:$0xff]  ;;  %v2589_v59 = vld [vmem:[%s3766_s2 + $0x120] sm:$0xff]  ;;  %v2588_v63 = vld [vmem:[%s3766_s2 + $0x118] sm:$0xff] }
  0x16   :  { %837 = vmatpush.bf16.msra.mxu0 %v2555_v5  ;;  %425 = vst [vmem:[#allocation1 + $0x5] ss:$9 sm:$0xff] %v3016_v34  ;;  %v2614_v58 = vld [vmem:[%s3766_s2 + $0x1e8] sm:$0xff]  ;;  %v2597_v60 = vld [vmem:[%s3766_s2 + $0x160] sm:$0xff]  ;;  %v2596_v0 = vld [vmem:[%s3766_s2 + $0x158] sm:$0xff]  ;;  %vm1719_vm5 = vcmask 1045508  }
  0x17   :  { %851 = vmatpush.bf16.msra.mxu1 %v2563_v11  ;;  %428 = vst [vmem:[#allocation1 + $0x6] ss:$9 sm:$0xff] %v3029_v37  ;;  %v2605_v61 = vld [vmem:[%s3766_s2 + $0x1a0] sm:$0xff]  ;;  %v2604_v1 = vld [vmem:[%s3766_s2 + $0x198] sm:$0xff]  ;;  %v2587_v3 = vld [vmem:[%s3766_s2 + $0x110] sm:$0xff]  ;;  %vm1728_vm6 = vcmask 1045504  }
  0x18   :  { %865 = vmatpush.bf16.msra.mxu2 %v2571_v15  ;;  %431 = vst [vmem:[#allocation1 + $0x7] ss:$9 sm:$0xff] %v3032_v38  ;;  %v2613_v62 = vld [vmem:[%s3766_s2 + $0x1e0] sm:$0xff]  ;;  %v2612_v2 = vld [vmem:[%s3766_s2 + $0x1d8] sm:$0xff]  ;;  %v2595_v4 = vld [vmem:[%s3766_s2 + $0x150] sm:$0xff]  ;;  %vm1726_vm7 = vcmask 1043458  }
  0x19   :  { %879 = vmatpush.bf16.msra.mxu3 %v2579_v21  ;;  %v2603_v5 = vld [vmem:[%s3766_s2 + $0x190] sm:$0xff]  ;;  %v2586_v7 = vld [vmem:[%s3766_s2 + $0x108] sm:$0xff]  ;;  %v2585_v12 = vld [vmem:[%s3766_s2 + $0x100] sm:$0xff]  ;;  %vm1721_vm8 = vcmask 1043456   ;;  %vm1730_vm11 = vcmask 1045506  }
  0x1a   :  { %838 = vmatpush.bf16.msra.mxu0 %v2554_v32  ;;  %v2611_v6 = vld [vmem:[%s3766_s2 + $0x1d0] sm:$0xff]  ;;  %v2594_v8 = vld [vmem:[%s3766_s2 + $0x148] sm:$0xff]  ;;  %v2593_v13 = vld [vmem:[%s3766_s2 + $0x140] sm:$0xff] }
  0x1b   :  { %852 = vmatpush.bf16.msra.mxu1 %v2562_v33  ;;  %v2602_v10 = vld [vmem:[%s3766_s2 + $0x188] sm:$0xff]  ;;  %v2601_v14 = vld [vmem:[%s3766_s2 + $0x180] sm:$0xff]  ;;  %v2282_v22 = vld [vmem:[%s3769_s4 + $0x70] sm:$0xf] }
  0x1c   :  { %866 = vmatpush.bf16.msra.mxu2 %v2570_v35  ;;  %v2610_v11 = vld [vmem:[%s3766_s2 + $0x1c8] sm:$0xff]  ;;  %v2609_v15 = vld [vmem:[%s3766_s2 + $0x1c0] sm:$0xff]  ;;  %v2632_v23 = vld [vmem:[%s3769_s4 + $0x74] sm:$0xf0] }
  0x1d   :  { %880 = vmatpush.bf16.msra.mxu3 %v2578_v36  ;;  %v2631_v24 = vld [vmem:[%s3769_s4 + $0x74] sm:$0xf]  ;;  %v2283_v26 = vor.u32 %v2632_v23, %v2282_v22  ;;  %v2284_v27 = vld [vmem:[%s3769_s4 + $0x78] sm:$0xf0]  ;;  %v2274_v28 = vld [vmem:[%s3769_s4 + $0x60] sm:$0xf] }
  0x1e   :  { %839 = vmatpush.bf16.msra.mxu0 %v2553_v39  ;;  %v2630_v30 = vld [vmem:[%s3769_s4 + $0x64] sm:$0xf0]  ;;  %v2287_v32 = vor.u32 %v2631_v24, %v2284_v27  ;;  %v2629_v33 = vld [vmem:[%s3769_s4 + $0x64] sm:$0xf]  ;;  %v2276_v35 = vld [vmem:[%s3769_s4 + $0x68] sm:$0xf0] }
  0x1f   :  { %853 = vmatpush.bf16.msra.mxu1 %v2561_v40  ;;  %v434_v51 = vld [vmem:[#allocation1 + $0x12] sm:$0xff]  ;;  %v432_v52 = vld [vmem:[#allocation1] sm:$0xff]  ;;  %v433_v54 = vld [vmem:[#allocation1 + $0x9] sm:$0xff]  ;;  %v2275_v36 = vor.u32 %v2630_v30, %v2274_v28  ;;  %v2279_v39 = vor.u32 %v2629_v33, %v2276_v35 }
  0x20   :  { %867 = vmatpush.bf16.msra.mxu2 %v2569_v41  ;;  %v435_v53 = vld [vmem:[#allocation1 + $0x1b] sm:$0xff]  ;;  %v436_v16 = vld [vmem:[#allocation1 + $0x24] sm:$0xff]  ;;  %v437_v17 = vld [vmem:[#allocation1 + $0x2d] sm:$0xff] }
  0x21   :  { %881 = vmatpush.bf16.msra.mxu3 %v2577_v42  ;;  %840 = vmatmul.bf16.vlgmr.msra.gmra.mxu0 %v432_v52  ;;  %v438_v18 = vld [vmem:[#allocation1 + $0x36] sm:$0xff]  ;;  %v439_v21 = vld [vmem:[#allocation1 + $0x3f] sm:$0xff]  ;;  %v2266_v40 = vld [vmem:[%s3769_s4 + $0x50] sm:$0xf] }
  0x22   :  { %888 = vmatpush.bf16.msrb.mxu0 %v2592_v43  ;;  %854 = vmatmul.bf16.vlgmr.msra.gmra.mxu1 %v433_v54  ;;  %v2628_v41 = vld [vmem:[%s3769_s4 + $0x54] sm:$0xf0]  ;;  %v2627_v42 = vld [vmem:[%s3769_s4 + $0x54] sm:$0xf]  ;;  %v2250_v52 = vld [vmem:[%s3769_s4 + $0x30] sm:$0xf] }
  0x23   :  { %902 = vmatpush.bf16.msrb.mxu1 %v2600_v44  ;;  %868 = vmatmul.bf16.vlgmr.msra.gmra.mxu2 %v434_v51  ;;  %v2267_v43 = vor.u32 %v2628_v41, %v2266_v40  ;;  %v2268_v44 = vld [vmem:[%s3769_s4 + $0x58] sm:$0xf0]  ;;  %v2623_v54 = vld [vmem:[%s3769_s4 + $0x34] sm:$0xf] }
  0x24   :  { %916 = vmatpush.bf16.msrb.mxu2 %v2608_v45  ;;  %882 = vmatmul.bf16.vlgmr.msra.gmra.mxu3 %v435_v53  ;;  %v2271_v45 = vor.u32 %v2627_v42, %v2268_v44  ;;  %v2624_v53 = vld [vmem:[%s3769_s4 + $0x34] sm:$0xf0] }
  0x25   :  { %930 = vmatpush.bf16.msrb.mxu3 %v2616_v46  ;;  %v2258_v46 = vld [vmem:[%s3769_s4 + $0x40] sm:$0xf] }
  0x26   :  { %889 = vmatpush.bf16.msrb.mxu0 %v2591_v47  ;;  %v2626_v47 = vld [vmem:[%s3769_s4 + $0x44] sm:$0xf0] }
  0x27   :  { %903 = vmatpush.bf16.msrb.mxu1 %v2599_v48  ;;  %v2625_v48 = vld [vmem:[%s3769_s4 + $0x44] sm:$0xf] }
  0x28   :  { %917 = vmatpush.bf16.msrb.mxu2 %v2607_v49  ;;  %v2259_v49 = vor.u32 %v2626_v47, %v2258_v46 }
  0x29   :  { %931 = vmatpush.bf16.msrb.mxu3 %v2615_v50  ;;  %v2260_v50 = vld [vmem:[%s3769_s4 + $0x48] sm:$0xf0] }
  0x2a   :  { %890 = vmatpush.bf16.msrb.mxu0 %v2590_v55  ;;  %v2263_v51 = vor.u32 %v2625_v48, %v2260_v50  ;;  %v2251_v55 = vor.u32 %v2624_v53, %v2250_v52 }
  0x2b   :  { %904 = vmatpush.bf16.msrb.mxu1 %v2598_v56  ;;  %v2252_v56 = vld [vmem:[%s3769_s4 + $0x38] sm:$0xf0] }
  0x2c   :  { %918 = vmatpush.bf16.msrb.mxu2 %v2606_v57  ;;  %v2255_v57 = vor.u32 %v2623_v54, %v2252_v56 }
  0x2d   :  { %932 = vmatpush.bf16.msrb.mxu3 %v2614_v58  ;;  %v2242_v58 = vld [vmem:[%s3769_s4 + $0x20] sm:$0xf] }
  0x2e   :  { %891 = vmatpush.bf16.msrb.mxu0 %v2589_v59  ;;  %v2622_v59 = vld [vmem:[%s3769_s4 + $0x24] sm:$0xf0] }
  0x2f   :  { %905 = vmatpush.bf16.msrb.mxu1 %v2597_v60  ;;  %v2621_v60 = vld [vmem:[%s3769_s4 + $0x24] sm:$0xf] }
  0x30   :  { %919 = vmatpush.bf16.msrb.mxu2 %v2605_v61  ;;  %v2243_v61 = vor.u32 %v2622_v59, %v2242_v58  ;;  %v2633_v58 = vld [vmem:[%s3770_s6] sm:$0xff] }
  0x31   :  { %933 = vmatpush.bf16.msrb.mxu3 %v2613_v62  ;;  %v2244_v62 = vld [vmem:[%s3769_s4 + $0x28] sm:$0xf0]  ;;  %v3253_v59 = vld [vmem:[%s3771_s5] sm:$0x3] }
  0x32   :  { %892 = vmatpush.bf16.msrb.mxu0 %v2588_v63  ;;  %v2247_v63 = vor.u32 %v2621_v60, %v2244_v62  ;;  %v966_v60 = vperm.slane %v3253_v59, 1  ;;  %v2695_v62 = vld [vmem:[%s3772_s8 + $0x1dc] sm:$0xf0] }
  0x33   :  { %906 = vmatpush.bf16.msrb.mxu1 %v2596_v0 }
  0x34   :  { %920 = vmatpush.bf16.msrb.mxu2 %v2604_v1  ;;  %v2234_v1 = vld [vmem:[%s3769_s4 + $0x10] sm:$0xf] }
  0x35   :  { %934 = vmatpush.bf16.msrb.mxu3 %v2612_v2  ;;  %v2620_v2 = vld [vmem:[%s3769_s4 + $0x14] sm:$0xf0] }
  0x36   :  { %893 = vmatpush.bf16.msrb.mxu0 %v2587_v3  ;;  %v2619_v3 = vld [vmem:[%s3769_s4 + $0x14] sm:$0xf] }
  0x37   :  { %907 = vmatpush.bf16.msrb.mxu1 %v2595_v4  ;;  %v2235_v4 = vor.u32 %v2620_v2, %v2234_v1  ;;  %v2525_v1 = vld [vmem:[%s3772_s8 + $0x1e0] sm:$0xf0]  ;;  %v2531_v2 = vld [vmem:[%s3772_s8 + $0x1c8] sm:$0xf] }
  0x38   :  { %921 = vmatpush.bf16.msrb.mxu2 %v2603_v5  ;;  %v2236_v5 = vld [vmem:[%s3769_s4 + $0x18] sm:$0xf0] }
  0x39   :  { %935 = vmatpush.bf16.msrb.mxu3 %v2611_v6  ;;  %v2239_v6 = vor.u32 %v2619_v3, %v2236_v5  ;;  %v2696_v3 = vld [vmem:[%s3772_s8 + $0x1e4] sm:$0xf0] }
  0x3a   :  { %894 = vmatpush.bf16.msrb.mxu0 %v2586_v7  ;;  %v2532_v5 = vor.u32 %v2696_v3, %v2531_v2 }
  0x3b   :  { %908 = vmatpush.bf16.msrb.mxu1 %v2594_v8  ;;  %v2226_v8 = vld [vmem:[%s3769_s4] sm:$0xf] }
  0x3c   :  { %922 = vmatpush.bf16.msrb.mxu2 %v2602_v10  ;;  %v2618_v10 = vld [vmem:[%s3769_s4 + $0x4] sm:$0xf0] }
  0x3d   :  { %936 = vmatpush.bf16.msrb.mxu3 %v2610_v11  ;;  %v2617_v11 = vld [vmem:[%s3769_s4 + $0x4] sm:$0xf] }
  0x3e   :  { %895 = vmatpush.bf16.msrb.mxu0 %v2585_v12  ;;  %v2227_v12 = vor.u32 %v2618_v10, %v2226_v8  ;;  %v2491_v8 = vld [vmem:[%s3772_s8 + $0x180] sm:$0xf] }
  0x3f   :  { %909 = vmatpush.bf16.msrb.mxu1 %v2593_v13  ;;  %v2228_v13 = vld [vmem:[%s3769_s4 + $0x8] sm:$0xf0] }
  0x40   :  { %923 = vmatpush.bf16.msrb.mxu2 %v2601_v14  ;;  %v2705_v14 = vld [vmem:[%s3768_s3] ss:$0 sm:$0xff] }
  0x41   :  { %937 = vmatpush.bf16.msrb.mxu3 %v2609_v15  ;;  %896 = vmatmul.bf16.vlgmr.msrb.gmra.mxu0 %v436_v16  ;;  %v2231_v15 = vor.u32 %v2617_v11, %v2228_v13  ;;  %v2687_v11 = vld [vmem:[%s3772_s8 + $0x19c] sm:$0xf0]  ;;  %v2493_v13 = vld [vmem:[%s3772_s8 + $0x1a0] sm:$0xf0] }
  0x42   :  { %910 = vmatmul.bf16.vlgmr.msrb.gmra.mxu1 %v437_v17  ;;  %1049 = vmatpush.bf16.msra.mxu0 %v2283_v26 }
  0x43   :  { %924 = vmatmul.bf16.vlgmr.msrb.gmra.mxu2 %v438_v18  ;;  %1063 = vmatpush.bf16.msra.mxu1 %v2287_v32 }
  0x44   :  { %938 = vmatmul.bf16.vlgmr.msrb.gmra.mxu3 %v439_v21 }
  0x46   :  { %1050 = vmatpush.bf16.msra.mxu0 %v2275_v36 }
  0x47   :  { %1064 = vmatpush.bf16.msra.mxu1 %v2279_v39 }
  0x4a   :  { %1051 = vmatpush.bf16.msra.mxu0 %v2267_v43 }
  0x4b   :  { %1065 = vmatpush.bf16.msra.mxu1 %v2271_v45 }
  0x4e   :  { %1052 = vmatpush.bf16.msra.mxu0 %v2259_v49 }
  0x4f   :  { %1066 = vmatpush.bf16.msra.mxu1 %v2263_v51 }
  0x52   :  { %1053 = vmatpush.bf16.msra.mxu0 %v2251_v55 }
  0x53   :  { %1067 = vmatpush.bf16.msra.mxu1 %v2255_v57  ;;  %v2634_v57 = vld [vmem:[%s3770_s6 + $0x8] sm:$0xff] }
  0x54   :  { %1118 = vmatpush.bf16.msra.mxu2 %v2634_v57 }
  0x56   :  { %1054 = vmatpush.bf16.msra.mxu0 %v2243_v61  ;;  %v2523_v61 = vld [vmem:[%s3772_s8 + $0x1c0] sm:$0xf] }
  0x57   :  { %1068 = vmatpush.bf16.msra.mxu1 %v2247_v63  ;;  %v2691_v63 = vld [vmem:[%s3772_s8 + $0x1c4] sm:$0xf] }
  0x58   :  { %1119 = vmatpush.bf16.msra.mxu2 %v2633_v58 }
  0x5a   :  { %1055 = vmatpush.bf16.msra.mxu0 %v2235_v4  ;;  %v2528_v4 = vor.u32 %v2691_v63, %v2525_v1  ;;  %v2461_v63 = vld [vmem:[%s3772_s8 + $0x160] sm:$0xf0]  ;;  %v2680_v1 = vld [vmem:[%s3772_s8 + $0x164] sm:$0xf0] }
  0x5b   :  { %1069 = vmatpush.bf16.msra.mxu1 %v2239_v6  ;;  %v2692_v6 = vld [vmem:[%s3772_s8 + $0x1cc] sm:$0xf] }
  0x5c   :  { %1545 = vmatpush.bf16.msrb.mxu2 %v2528_v4  ;;  %v2676_v4 = vld [vmem:[%s3772_s8 + $0x14c] sm:$0xf] }
  0x5e   :  { %1056 = vmatpush.bf16.msra.mxu0 %v2227_v12  ;;  %v2683_v12 = vld [vmem:[%s3772_s8 + $0x184] sm:$0xf] }
  0x5f   :  { %1070 = vmatpush.bf16.msra.mxu1 %v2231_v15  ;;  %v2492_v15 = vor.u32 %v2687_v11, %v2491_v8  ;;  %v2671_v8 = vld [vmem:[%s3772_s8 + $0x11c] sm:$0xf0] }
  0x62   :  { %1559 = vmatpush.bf16.msrb.mxu0 %v2532_v5  ;;  %v2469_v5 = vld [vmem:[%s3772_s8 + $0x168] sm:$0xf0] }
  0x9e   :  { %v841_v0 = vpop.f32.mrf.mxu0 }
  0x9f   :  { %v855_v7 = vpop.f32.mrf.mxu1  ;;  %v842_v18 = vadd.f32 %v2705_v14, %v841_v0  ;;  %v2524_v0 = vor.u32 %v2695_v62, %v2523_v61  ;;  %v2675_v61 = vld [vmem:[%s3772_s8 + $0x144] sm:$0xf] }
  0xa0   :  { %v2464_v2 = vor.u32 %v2675_v61, %v2461_v63  ;;  %v2341_v63 = vld [vmem:[%s3772_s8 + $0x68] sm:$0xf0] }
  0xa1   :  { %v856_v23 = vadd.f32 %v855_v7, %v842_v18  ;;  %v2533_v7 = vld [vmem:[%s3772_s8 + $0x1e8] sm:$0xf0]  ;;  %1531 = vmatpush.bf16.msra.mxu3 %v2524_v0  ;;  %v2688_v18 = vld [vmem:[%s3772_s8 + $0x1a4] sm:$0xf0] }
  0xa2   :  { %v2536_v10 = vor.u32 %v2692_v6, %v2533_v7  ;;  %v2467_v0 = vld [vmem:[%s3772_s8 + $0x148] sm:$0xf]  ;;  %v2472_v6 = vor.u32 %v2676_v4, %v2469_v5  ;;  %v2427_v7 = vld [vmem:[%s3772_s8 + $0x100] sm:$0xf]  ;;  %v2301_v4 = vld [vmem:[%s3772_s8 + $0x20] sm:$0xf0] }
  0xa3   :  { %v2468_v3 = vor.u32 %v2680_v1, %v2467_v0  ;;  %v2428_v11 = vor.u32 %v2671_v8, %v2427_v7  ;;  %v2299_v0 = vld [vmem:[%s3772_s8] sm:$0xf]  ;;  %v2307_v7 = vld [vmem:[%s3772_s8 + $0x8] sm:$0xf] }
  0xa4   :  { %1573 = vmatpush.bf16.msrb.mxu1 %v2536_v10  ;;  %v2667_v10 = vld [vmem:[%s3772_s8 + $0x104] sm:$0xf]  ;;  %v2640_v8 = vld [vmem:[%s3772_s8 + $0x24] sm:$0xf0] }
  0xa5   :  { %1532 = vmatpush.bf16.msra.mxu3 %v2492_v15 }
  0xa6   :  { %v869_v16 = vpop.f32.mrf.mxu2  ;;  %v843_v21 = vpop.f32.mrf.mxu0 }
  0xa7   :  { %v883_v17 = vpop.f32.mrf.mxu3  ;;  %v857_v22 = vpop.f32.mrf.mxu1  ;;  %v844_v24 = vadd.f32 %v2705_v14, %v843_v21  ;;  %v870_v28 = vadd.f32 %v869_v16, %v856_v23  ;;  %v2496_v16 = vor.u32 %v2683_v12, %v2493_v13  ;;  %v2684_v21 = vld [vmem:[%s3772_s8 + $0x18c] sm:$0xf]  ;;  %v2429_v12 = vld [vmem:[%s3772_s8 + $0x120] sm:$0xf0]  ;;  %v2435_v13 = vld [vmem:[%s3772_s8 + $0x108] sm:$0xf] }
  0xa8   :  { %v2432_v15 = vor.u32 %v2667_v10, %v2429_v12  ;;  %v2636_v10 = vld [vmem:[%s3772_s8 + $0xc] sm:$0xf] }
  0xa9   :  { %v858_v30 = vadd.f32 %v857_v22, %v844_v24  ;;  %v884_v35 = vadd.f32 %v883_v17, %v870_v28  ;;  %v2499_v17 = vld [vmem:[%s3772_s8 + $0x188] sm:$0xf]  ;;  %v2501_v24 = vld [vmem:[%s3772_s8 + $0x1a8] sm:$0xf0]  ;;  %v2716_v28 = vmov 0.0   ;;  %1546 = vmatpush.bf16.msrb.mxu2 %v2496_v16 }
  0xaa   :  { %v2500_v23 = vor.u32 %v2688_v18, %v2499_v17  ;;  %127 = vst [vmem:[%s3773_s10] sm:$0x1] %v2716_v28  ;;  %v2668_v17 = vld [vmem:[%s3772_s8 + $0x10c] sm:$0xf] }
  0xab   :  { %v2437_v18 = vld [vmem:[%s3772_s8 + $0x128] sm:$0xf0]  ;;  %128 = vst [vmem:[%s3776_s11] sm:$0x1] %v2716_v28 }
  0xac   :  { %1560 = vmatpush.bf16.msrb.mxu0 %v2500_v23  ;;  %v2663_v23 = vld [vmem:[%s3772_s8 + $0xdc] sm:$0xf0]  ;;  %v2309_v12 = vld [vmem:[%s3772_s8 + $0x28] sm:$0xf0] }
  0xad   :  { %1547 = vmatpush.bf16.msrb.mxu2 %v2464_v2  ;;  %v2639_v2 = vld [vmem:[%s3772_s8 + $0x1c] sm:$0xf0] }
  0xae   :  { %v871_v26 = vpop.f32.mrf.mxu2  ;;  %v2300_v5 = vor.u32 %v2639_v2, %v2299_v0  ;;  %v2445_v2 = vld [vmem:[%s3772_s8 + $0x130] sm:$0xf0] }
  0xaf   :  { %v885_v27 = vpop.f32.mrf.mxu3  ;;  %v872_v36 = vadd.f32 %v871_v26, %v858_v30  ;;  %v965_v26 = vperm.slane %v3253_v59, 0  ;;  %v2459_v59 = vld [vmem:[%s3772_s8 + $0x140] sm:$0xf] }
  0xb0   :  { %1561 = vmatpush.bf16.msrb.mxu0 %v2468_v3  ;;  %v2635_v3 = vld [vmem:[%s3772_s8 + $0x4] sm:$0xf] }
  0xb1   :  { %v886_v42 = vadd.f32 %v885_v27, %v872_v36  ;;  %v2504_v27 = vor.u32 %v2684_v21, %v2501_v24  ;;  %v2440_v21 = vor.u32 %v2668_v17, %v2437_v18  ;;  %1548 = vmatpush.bf16.msrb.mxu2 %v2432_v15  ;;  %v2659_v24 = vld [vmem:[%s3772_s8 + $0xc4] sm:$0xf]  ;;  %v2697_v15 = vld [vmem:[%s3772_s8 + $0x1ec] sm:$0xf0]  ;;  %v2541_v17 = vld [vmem:[%s3772_s8 + $0x1f0] sm:$0xf0] }
  0xb3   :  { %1574 = vmatpush.bf16.msrb.mxu1 %v2504_v27  ;;  %v2397_v27 = vld [vmem:[%s3772_s8 + $0xe0] sm:$0xf0] }
  0xb7   :  { %1575 = vmatpush.bf16.msrb.mxu1 %v2472_v6  ;;  %v2304_v6 = vor.u32 %v2635_v3, %v2301_v4  ;;  %v2451_v3 = vld [vmem:[%s3772_s8 + $0x118] sm:$0xf] }
  0xbb   :  { %1576 = vmatpush.bf16.msrb.mxu1 %v2440_v21 }
  0xbe   :  { %v897_v32 = vpop.f32.mrf.mxu0 }
  0xbf   :  { %v911_v33 = vpop.f32.mrf.mxu1  ;;  %v898_v39 = vadd.f32 %v897_v32, %v884_v35 }
  0xc1   :  { %v912_v44 = vadd.f32 %v911_v33, %v898_v39 }
  0xc6   :  { %v925_v40 = vpop.f32.mrf.mxu2  ;;  %v899_v43 = vpop.f32.mrf.mxu0 }
  0xc7   :  { %v939_v41 = vpop.f32.mrf.mxu3  ;;  %v900_v45 = vadd.f32 %v899_v43, %v886_v42  ;;  %v926_v46 = vadd.f32 %v925_v40, %v912_v44  ;;  %v913_v47 = vpop.f32.mrf.mxu1 }
  0xc9   :  { %v914_v48 = vadd.f32 %v913_v47, %v900_v45  ;;  %v940_v50 = vadd.f32 %v939_v41, %v926_v46  ;;  %v137_v45 = vld [vmem:[%s3774_s1] sm:$0xff] }
  0xcb   :  { %v944_v54 = vmax.f32 %v940_v50, 0.0 }
  0xce   :  { %v927_v49 = vpop.f32.mrf.mxu2 }
  0xcf   :  { %v928_v51 = vadd.f32 %v927_v49, %v914_v48  ;;  %v941_v52 = vpop.f32.mrf.mxu3  ;;  %v275_v49 = vsel %vm147_vm0, %v137_v45, 0.0  ;;  %v2365_v45 = vld [vmem:[%s3772_s8 + $0xa0] sm:$0xf0] }
  0xd1   :  { %v942_v53 = vadd.f32 %v941_v52, %v928_v51 }
  0xd3   :  { %v945_v55 = vmax.f32 %v942_v53, 0.0 }
  0xd5   :  { %v946_v56 = vpack.c.bf16 %v945_v55, %v944_v54 }
  0xd7   :  { %1057 = vmatmul.bf16.vlgmr.msra.gmra.mxu0 %v946_v56  ;;  %1071 = vmatmul.bf16.vlgmr.msra.gmra.mxu1 %v946_v56 }
 0x154   :  { %v1072_v14 = vpop.f32.mrf.mxu1  ;;  %v1058_v30 = vpop.f32.mrf.mxu0 }
 0x155   :  { %v1073_v22 = vadd.f32 %v1072_v14, %v966_v60  ;;  %v1059_v35 = vadd.f32 %v1058_v30, %v965_v26  ;;  %v2672_v14 = vld [vmem:[%s3772_s8 + $0x124] sm:$0xf0] }
 0x156   :  { %v2436_v16 = vor.u32 %v2672_v14, %v2435_v13  ;;  %v2403_v30 = vld [vmem:[%s3772_s8 + $0xc8] sm:$0xf]  ;;  %v2539_v13 = vld [vmem:[%s3772_s8 + $0x1d0] sm:$0xf]  ;;  %v2312_v14 = vor.u32 %v2636_v10, %v2309_v12  ;;  %v2453_v10 = vld [vmem:[%s3772_s8 + $0x138] sm:$0xf0] }
 0x157   :  { %v1077_v32 = vmul.f32 0.5, %v1073_v22  ;;  %v1645_v40 = vmul.f32 %v1059_v35, %v1059_v35  ;;  %v1643_v41 = vadd.f32 1.0, %v1073_v22  ;;  %v2395_v22 = vld [vmem:[%s3772_s8 + $0xc0] sm:$0xf]  ;;  %v2540_v18 = vor.u32 %v2697_v15, %v2539_v13  ;;  %v2411_v13 = vld [vmem:[%s3772_s8 + $0xd0] sm:$0xf] }
 0x158   :  { %1562 = vmatpush.bf16.msrb.mxu0 %v2436_v16  ;;  %v2693_v16 = vld [vmem:[%s3772_s8 + $0x1d4] sm:$0xf] }
 0x159   :  { %v1079_v33 = vmul.f32 1.442695, %v1077_v32  ;;  %v1647_v46 = vsub.f32 %v1643_v41, %v1645_v40  ;;  %v2664_v32 = vld [vmem:[%s3772_s8 + $0xe4] sm:$0xf0]  ;;  %v2363_v41 = vld [vmem:[%s3772_s8 + $0x80] sm:$0xf]  ;;  %v2544_v21 = vor.u32 %v2693_v16, %v2541_v17 }
 0x15a   :  { %v2661_v15 = vld [vmem:[%s3772_s8 + $0xd4] sm:$0xf] }
 0x15b   :  { %2707 = vpow2.f32 %v1079_v33  ;;  %v2400_v33 = vor.u32 %v2659_v24, %v2397_v27  ;;  %v2694_v24 = vld [vmem:[%s3772_s8 + $0x1dc] sm:$0xf] }
 0x15c   :  { %v1074_v36 = vpop.f32.mrf.mxu1  ;;  %v1060_v51 = vpop.f32.mrf.mxu0  ;;  %v2549_v27 = vld [vmem:[%s3772_s8 + $0x1f8] sm:$0xf0] }
 0x15d   :  { %v1075_v39 = vadd.f32 %v1074_v36, %v966_v60  ;;  %v1061_v54 = vadd.f32 %v1060_v51, %v965_v26  ;;  %v2679_v60 = vld [vmem:[%s3772_s8 + $0x15c] sm:$0xf0]  ;;  %v2396_v26 = vor.u32 %v2663_v23, %v2395_v22  ;;  %v2660_v36 = vld [vmem:[%s3772_s8 + $0xcc] sm:$0xf]  ;;  %1549 = vmatpush.bf16.msrb.mxu2 %v2400_v33  ;;  %v2547_v22 = vld [vmem:[%s3772_s8 + $0x1d8] sm:$0xf] }
 0x15e   :  { %v2460_v62 = vor.u32 %v2679_v60, %v2459_v59  ;;  %v2373_v51 = vld [vmem:[%s3772_s8 + $0xa8] sm:$0xf0]  ;;  %v2648_v59 = vld [vmem:[%s3772_s8 + $0x64] sm:$0xf0]  ;;  %v2698_v23 = vld [vmem:[%s3772_s8 + $0x1f4] sm:$0xf0] }
 0x15f   :  { %v1078_v42 = vmul.f32 0.5, %v1075_v39  ;;  %v2405_v39 = vld [vmem:[%s3772_s8 + $0xe8] sm:$0xf0]  ;;  %v2689_v33 = vld [vmem:[%s3772_s8 + $0x1ac] sm:$0xf0] }
 0x160   :  { %1533 = vmatpush.bf16.msra.mxu3 %v2460_v62  ;;  %v2408_v40 = vor.u32 %v2660_v36, %v2405_v39  ;;  %v2644_v62 = vld [vmem:[%s3772_s8 + $0x4c] sm:$0xf]  ;;  %v2509_v39 = vld [vmem:[%s3772_s8 + $0x1b0] sm:$0xf0] }
 0x161   :  { %v2708_v43 = vpop.eup %2707  ;;  %v1081_v44 = vmul.f32 1.442695, %v1078_v42  ;;  %v2655_v42 = vld [vmem:[%s3772_s8 + $0x9c] sm:$0xf0]  ;;  %v2344_v1 = vor.u32 %v2644_v62, %v2341_v63  ;;  %v2673_v62 = vld [vmem:[%s3772_s8 + $0x12c] sm:$0xf0] }
 0x162   :  { %v1649_v47 = vmul.f32 %v2708_v43, %v2708_v43  ;;  %v1083_v52 = vmul.f32 %v2708_v43, %v275_v49  ;;  %v2651_v43 = vld [vmem:[%s3772_s8 + $0x84] sm:$0xf]  ;;  %1577 = vmatpush.bf16.msrb.mxu1 %v2408_v40  ;;  %v2515_v40 = vld [vmem:[%s3772_s8 + $0x198] sm:$0xf]  ;;  %v2669_v63 = vld [vmem:[%s3772_s8 + $0x114] sm:$0xf] }
 0x163   :  { %2709 = vpow2.f32 %v1081_v44  ;;  %v2364_v44 = vor.u32 %v2655_v42, %v2363_v41  ;;  %v2690_v41 = vld [vmem:[%s3772_s8 + $0x1b4] sm:$0xf0] }
 0x164   :  { %v1651_v48 = vsub.f32 %v1647_v46, %v1649_v47  ;;  %v1085_v56 = vadd.f32 %v1083_v52, %v1059_v35  ;;  %1534 = vmatpush.bf16.msra.mxu3 %v2428_v11  ;;  %v2404_v35 = vor.u32 %v2664_v32, %v2403_v30  ;;  %v2371_v46 = vld [vmem:[%s3772_s8 + $0x88] sm:$0xf]  ;;  %v2308_v11 = vor.u32 %v2640_v8, %v2307_v7  ;;  %v2507_v32 = vld [vmem:[%s3772_s8 + $0x190] sm:$0xf]  ;;  %v2670_v7 = vld [vmem:[%s3772_s8 + $0x11c] sm:$0xf] }
 0x165   :  { %v2656_v47 = vld [vmem:[%s3772_s8 + $0xa4] sm:$0xf0]  ;;  %v2552_v30 = vor.u32 %v2694_v24, %v2549_v27  ;;  %v2508_v36 = vor.u32 %v2689_v33, %v2507_v32  ;;  %v2456_v12 = vor.u32 %v2670_v7, %v2453_v10  ;;  %v2662_v24 = vld [vmem:[%s3772_s8 + $0xdc] sm:$0xf]  ;;  %v2379_v33 = vld [vmem:[%s3772_s8 + $0x90] sm:$0xf] }
 0x166   :  { %v1653_v50 = vsel %vm1108_vm3, %v1651_v48, 0.0  ;;  %1563 = vmatpush.bf16.msrb.mxu0 %v2404_v35  ;;  %v2368_v48 = vor.u32 %v2651_v43, %v2365_v45  ;;  %v2372_v49 = vor.u32 %v2656_v47, %v2371_v46  ;;  %v2685_v35 = vld [vmem:[%s3772_s8 + $0x194] sm:$0xf]  ;;  %v2516_v43 = vor.u32 %v2690_v41, %v2515_v40  ;;  %v2517_v45 = vld [vmem:[%s3772_s8 + $0x1b8] sm:$0xf0] }
 0x167   :  { %1654 = vadd.xlane.f32.xlu0 %v1653_v50  ;;  %v2652_v50 = vld [vmem:[%s3772_s8 + $0x8c] sm:$0xf]  ;;  %v2512_v42 = vor.u32 %v2685_v35, %v2509_v39  ;;  %v2475_v47 = vld [vmem:[%s3772_s8 + $0x150] sm:$0xf]  ;;  %v1670_v39 = vld [vmem:[%s3773_s10] sm:$0x1] }
 0x168   :  { %1535 = vmatpush.bf16.msra.mxu3 %v2396_v26  ;;  %v2376_v52 = vor.u32 %v2652_v50, %v2373_v51  ;;  %1550 = vmatpush.bf16.msrb.mxu2 %v2368_v48  ;;  %v2548_v26 = vor.u32 %v2698_v23, %v2547_v22  ;;  %v2681_v48 = vld [vmem:[%s3772_s8 + $0x16c] sm:$0xf0]  ;;  %v2477_v51 = vld [vmem:[%s3772_s8 + $0x170] sm:$0xf0]  ;;  %v2666_v23 = vld [vmem:[%s3772_s8 + $0xf4] sm:$0xf0] }
 0x169   :  { %v2710_v53 = vpop.eup %2709  ;;  %v2476_v50 = vor.u32 %v2681_v48, %v2475_v47  ;;  %v2657_v35 = vld [vmem:[%s3772_s8 + $0xac] sm:$0xf0]  ;;  %v2381_v41 = vld [vmem:[%s3772_s8 + $0xb0] sm:$0xf0]  ;;  %v2654_v47 = vld [vmem:[%s3772_s8 + $0x9c] sm:$0xf] }
 0x16a   :  { %v1084_v55 = vmul.f32 0.0, %v2710_v53  ;;  %1564 = vmatpush.bf16.msrb.mxu0 %v2372_v49  ;;  %v2331_v53 = vld [vmem:[%s3772_s8 + $0x40] sm:$0xf]  ;;  %1578 = vmatpush.bf16.msrb.mxu1 %v2376_v52  ;;  %v2677_v49 = vld [vmem:[%s3772_s8 + $0x154] sm:$0xf]  ;;  %v2380_v40 = vor.u32 %v2657_v35, %v2379_v33 }
 0x16b   :  { %v2483_v52 = vld [vmem:[%s3772_s8 + $0x158] sm:$0xf]  ;;  %v2389_v48 = vld [vmem:[%s3772_s8 + $0xb8] sm:$0xf0] }
 0x16c   :  { %v1086_v57 = vadd.f32 %v1084_v55, %v1061_v54  ;;  %1536 = vmatpush.bf16.msra.mxu3 %v2364_v44  ;;  %v2647_v54 = vld [vmem:[%s3772_s8 + $0x5c] sm:$0xf0]  ;;  %v2643_v55 = vld [vmem:[%s3772_s8 + $0x44] sm:$0xf]  ;;  %v2686_v44 = vld [vmem:[%s3772_s8 + $0x19c] sm:$0xf] }
 0x16d   :  { %v2520_v46 = vor.u32 %v2686_v44, %v2517_v45 }
 0x16e   :  { %v1087_v58 = vpack.c.bf16 %v1086_v57, %v1085_v56  ;;  %v2332_v56 = vor.u32 %v2647_v54, %v2331_v53  ;;  %v2333_v57 = vld [vmem:[%s3772_s8 + $0x60] sm:$0xf0]  ;;  %1579 = vmatpush.bf16.msrb.mxu1 %v2344_v1  ;;  %v2682_v53 = vld [vmem:[%s3772_s8 + $0x174] sm:$0xf0] }
 0x16f   :  { %v2336_v60 = vor.u32 %v2643_v55, %v2333_v57  ;;  %v2480_v55 = vor.u32 %v2677_v49, %v2477_v51  ;;  %v2678_v57 = vld [vmem:[%s3772_s8 + $0x15c] sm:$0xf]  ;;  %v2392_v49 = vor.u32 %v2654_v47, %v2389_v48  ;;  %v2649_v51 = vld [vmem:[%s3772_s8 + $0x6c] sm:$0xf0] }
 0x170   :  { %2296 = vmatmul.msk.bf16.vlgmr.msra.gmra.mxu2 %vm1108_vm3, %v1087_v58  ;;  %v2339_v58 = vld [vmem:[%s3772_s8 + $0x48] sm:$0xf]  ;;  %1537 = vmatpush.bf16.msra.mxu3 %v2332_v56  ;;  %v2484_v56 = vor.u32 %v2682_v53, %v2483_v52  ;;  %v2645_v52 = vld [vmem:[%s3772_s8 + $0x54] sm:$0xf] }
 0x171   :  { %v2340_v61 = vor.u32 %v2648_v59, %v2339_v58  ;;  %1551 = vmatpush.bf16.msrb.mxu2 %v2336_v60  ;;  %v2485_v58 = vld [vmem:[%s3772_s8 + $0x178] sm:$0xf0] }
 0x172   :  { %1580 = vmatpush.bf16.msrb.mxu1 %v2312_v14  ;;  %v2488_v60 = vor.u32 %v2678_v57, %v2485_v58  ;;  %v2665_v14 = vld [vmem:[%s3772_s8 + $0xec] sm:$0xf0]  ;;  %v2650_v57 = vld [vmem:[%s3772_s8 + $0x74] sm:$0xf0] }
 0x173   :  { %1565 = vmatpush.bf16.msrb.mxu0 %v2340_v61  ;;  %v2443_v61 = vld [vmem:[%s3772_s8 + $0x110] sm:$0xf]  ;;  %v2412_v17 = vor.u32 %v2665_v14, %v2411_v13  ;;  %v2706_v14 = vld [vmem:[%s3775_s7] ss:$0 sm:$0xff] }
 0x174   :  { %1538 = vmatpush.bf16.msra.mxu3 %v2300_v5  ;;  %v2444_v1 = vor.u32 %v2673_v62, %v2443_v61  ;;  %v2448_v5 = vor.u32 %v2669_v63, %v2445_v2  ;;  %v2315_v61 = vld [vmem:[%s3772_s8 + $0x10] sm:$0xf]  ;;  %v2637_v2 = vld [vmem:[%s3772_s8 + $0x14] sm:$0xf] }
 0x175   :  { %1552 = vmatpush.bf16.msrb.mxu2 %v2304_v6  ;;  %v2674_v6 = vld [vmem:[%s3772_s8 + $0x134] sm:$0xf0] }
 0x176   :  { %1629 = vmatpush.bf16.msra.mxu1 %v2552_v30  ;;  %v2452_v8 = vor.u32 %v2674_v6, %v2451_v3  ;;  %v2317_v3 = vld [vmem:[%s3772_s8 + $0x30] sm:$0xf0]  ;;  %v2638_v6 = vld [vmem:[%s3772_s8 + $0x1c] sm:$0xf] }
 0x177   :  { %1566 = vmatpush.bf16.msrb.mxu0 %v2308_v11  ;;  %v2320_v10 = vor.u32 %v2637_v2, %v2317_v3 }
 0x178   :  { %1587 = vmatpush.bf16.msrb.mxu3 %v2540_v18  ;;  %v2413_v18 = vld [vmem:[%s3772_s8 + $0xf0] sm:$0xf0] }
 0x179   :  { %1601 = vmatpush.bf16.msra.mxu2 %v2544_v21  ;;  %v2419_v21 = vld [vmem:[%s3772_s8 + $0xd8] sm:$0xf]  ;;  %v2416_v22 = vor.u32 %v2661_v15, %v2413_v18 }
 0x17a   :  { %1630 = vmatpush.bf16.msra.mxu1 %v2520_v46  ;;  %v2420_v30 = vor.u32 %v2666_v23, %v2419_v21  ;;  %v3668_v23 = vld [vmem:[%s3777_s9] sm:$0xff] }
 0x17b   :  { %1615 = vmatpush.bf16.msra.mxu0 %v2548_v26  ;;  %v2421_v26 = vld [vmem:[%s3772_s8 + $0xf8] sm:$0xf0]  ;;  %v1196_v35 = vperm.slane %v3668_v23, 1 }
 0x17c   :  { %1588 = vmatpush.bf16.msrb.mxu3 %v2508_v36  ;;  %v2424_v32 = vor.u32 %v2662_v24, %v2421_v26  ;;  %v2653_v36 = vld [vmem:[%s3772_s8 + $0x94] sm:$0xf]  ;;  %v1197_v24 = vperm.slane %v3668_v23, 2  ;;  %v1198_v26 = vperm.slane %v3668_v23, 3 }
 0x17d   :  { %1602 = vmatpush.bf16.msra.mxu2 %v2512_v42  ;;  %v2387_v42 = vld [vmem:[%s3772_s8 + $0x98] sm:$0xf]  ;;  %v2384_v45 = vor.u32 %v2653_v36, %v2381_v41 }
 0x17e   :  { %1631 = vmatpush.bf16.msra.mxu1 %v2488_v60  ;;  %v2357_v60 = vld [vmem:[%s3772_s8 + $0x78] sm:$0xf0] }
 0x17f   :  { %1616 = vmatpush.bf16.msra.mxu0 %v2516_v43  ;;  %v2658_v43 = vld [vmem:[%s3772_s8 + $0xb4] sm:$0xf0] }
 0x180   :  { %1589 = vmatpush.bf16.msrb.mxu3 %v2476_v50  ;;  %v2388_v46 = vor.u32 %v2658_v43, %v2387_v42  ;;  %v2347_v50 = vld [vmem:[%s3772_s8 + $0x50] sm:$0xf]  ;;  %v1673_v43 = vunpack.c.l.bf16 %v2949_v19 }
 0x181   :  { %1603 = vmatpush.bf16.msra.mxu2 %v2480_v55  ;;  %v2349_v55 = vld [vmem:[%s3772_s8 + $0x70] sm:$0xf0] }
 0x182   :  { %1632 = vmatpush.bf16.msra.mxu1 %v2456_v12  ;;  %v2352_v58 = vor.u32 %v2645_v52, %v2349_v55 }
 0x183   :  { %1617 = vmatpush.bf16.msra.mxu0 %v2484_v56  ;;  %v2355_v56 = vld [vmem:[%s3772_s8 + $0x58] sm:$0xf] }
 0x184   :  { %1590 = vmatpush.bf16.msrb.mxu3 %v2444_v1  ;;  %v2356_v63 = vor.u32 %v2650_v57, %v2355_v56  ;;  %v2641_v1 = vld [vmem:[%s3772_s8 + $0x2c] sm:$0xf0] }
 0x185   :  { %1604 = vmatpush.bf16.msra.mxu2 %v2448_v5  ;;  %v2642_v5 = vld [vmem:[%s3772_s8 + $0x34] sm:$0xf0]  ;;  %v2316_v7 = vor.u32 %v2641_v1, %v2315_v61 }
 0x186   :  { %1633 = vmatpush.bf16.msra.mxu1 %v2424_v32 }
 0x187   :  { %1618 = vmatpush.bf16.msra.mxu0 %v2452_v8  ;;  %v2325_v8 = vld [vmem:[%s3772_s8 + $0x38] sm:$0xf0] }
 0x188   :  { %1591 = vmatpush.bf16.msrb.mxu3 %v2412_v17  ;;  %v2328_v12 = vor.u32 %v2638_v6, %v2325_v8  ;;  %v1201_v6 = vperm.slane %v3668_v23, 6 }
 0x189   :  { %1605 = vmatpush.bf16.msra.mxu2 %v2416_v22 }
 0x18a   :  { %1634 = vmatpush.bf16.msra.mxu1 %v2392_v49 }
 0x18b   :  { %1619 = vmatpush.bf16.msra.mxu0 %v2420_v30 }
 0x18c   :  { %1592 = vmatpush.bf16.msrb.mxu3 %v2380_v40  ;;  %v1195_v40 = vperm.slane %v3668_v23, 0 }
 0x18d   :  { %1606 = vmatpush.bf16.msra.mxu2 %v2384_v45  ;;  %v1677_v45 = vunpack.c.l.bf16 %v2973_v25 }
 0x18f   :  { %1620 = vmatpush.bf16.msra.mxu0 %v2388_v46  ;;  %v1679_v46 = vunpack.c.l.bf16 %v2993_v29 }
 0x191   :  { %1607 = vmatpush.bf16.msra.mxu2 %v2352_v58 }
 0x193   :  { %1621 = vmatpush.bf16.msra.mxu0 %v2356_v63 }
 0x195   :  { %1608 = vmatpush.bf16.msra.mxu2 %v2320_v10 }
 0x1da   :  { %v1655_v54 = vpop.xlane.xlu0 %1654 }
 0x1db   :  { %v1659_v59 = vmul.f32 -0.5, %v1655_v54  ;;  %v2348_v54 = vor.u32 %v2649_v51, %v2347_v50 }
 0x1dd   :  { %v1661_v0 = vsel %vm147_vm0, %v1659_v59, 0.0  ;;  %v2646_v59 = vld [vmem:[%s3772_s8 + $0x5c] sm:$0xf]  ;;  %1593 = vmatpush.bf16.msrb.mxu3 %v2348_v54 }
 0x1de   :  { %v1664_v4 = vrot.slane %v1661_v0, 4 }
 0x1e0   :  { %v1665_v11 = vadd.f32 %v1664_v4, %v1661_v0  ;;  %v2360_v0 = vor.u32 %v2646_v59, %v2357_v60  ;;  %v2323_v4 = vld [vmem:[%s3772_s8 + $0x18] sm:$0xf] }
 0x1e1   :  { %1594 = vmatpush.bf16.msrb.mxu3 %v2316_v7 }
 0x1e2   :  { %v1666_v16 = vrot.slane %v1665_v11, 2  ;;  %1635 = vmatpush.bf16.msra.mxu1 %v2360_v0 }
 0x1e4   :  { %v1667_v27 = vadd.f32 %v1666_v16, %v1665_v11  ;;  %v2324_v11 = vor.u32 %v2642_v5, %v2323_v4 }
 0x1e6   :  { %v1668_v44 = vrot.slane %v1667_v27, 1  ;;  %1622 = vmatpush.bf16.msra.mxu0 %v2324_v11  ;;  %1636 = vmatpush.bf16.msra.mxu1 %v2328_v12 }
 0x1e8   :  { %v1669_v53 = vadd.f32 %v1668_v44, %v1667_v27  ;;  %v1675_v44 = vunpack.c.l.bf16 %v2951_v20 }
 0x1ea   :  { %v1671_v62 = vadd.f32 %v1670_v39, %v1669_v53 }
 0x1ec   :  { %1672 = vst [vmem:[%s3773_s10] sm:$0x1] %v1671_v62 }
 0x1f3   :  { %v1121_v13 = vpop.f32.mrf.mxu2 }
 0x1f4   :  { %v1122_v15 = vadd.f32 %v2706_v14, %v1121_v13 }
 0x1f6   :  { %v1126_v18 = vmax.f32 %v1122_v15, 0.0  ;;  %v1202_v15 = vperm.slane %v3668_v23, 7 }
 0x1fb   :  { %v1123_v16 = vpop.f32.mrf.mxu2 }
 0x1fc   :  { %v1124_v17 = vadd.f32 %v2706_v14, %v1123_v16 }
 0x1fe   :  { %v1127_v21 = vmax.f32 %v1124_v17, 0.0 }
 0x200   :  { %v1128_v22 = vpack.c.bf16 %v1127_v21, %v1126_v18 }
 0x202   :  { %1539 = vmatmul.bf16.vlgmr.msra.gmra.mxu3 %v1128_v22  ;;  %1553 = vmatmul.bf16.vlgmr.msrb.gmra.mxu2 %v1128_v22 }
 0x203   :  { %1567 = vmatmul.bf16.vlgmr.msrb.gmra.mxu0 %v1128_v22  ;;  %1581 = vmatmul.bf16.vlgmr.msrb.gmra.mxu1 %v1128_v22 }
 0x212   :  { %1595 = vmatmul.bf16.vlgmr.msrb.gmra.mxu3 %v1128_v22  ;;  %1609 = vmatmul.bf16.vlgmr.msra.gmra.mxu2 %v1128_v22 }
 0x213   :  { %1623 = vmatmul.bf16.vlgmr.msra.gmra.mxu0 %v1128_v22  ;;  %1637 = vmatmul.bf16.vlgmr.msra.gmra.mxu1 %v1128_v22 }
 0x280   :  { %v1568_v27 = vpop.f32.mrf.mxu0  ;;  %v1582_v30 = vpop.f32.mrf.mxu1 }
 0x281   :  { %v1569_v32 = vadd.f32 %v1568_v27, %v1197_v24  ;;  %v1583_v33 = vadd.f32 %v1582_v30, %v1198_v26  ;;  %v1683_v30 = vunpack.c.l.bf16 %v3016_v34 }
 0x283   :  { %v1706_v36 = vrot.slane %v1569_v32, 4  ;;  %v1707_v39 = vrot.slane %v1583_v33, 2  ;;  %v1685_v32 = vunpack.c.l.bf16 %v3029_v37  ;;  %v1687_v33 = vunpack.c.l.bf16 %v3032_v38 }
 0x285   :  { %v1540_v28 = vpop.f32.mrf.mxu3  ;;  %v1554_v41 = vpop.f32.mrf.mxu2  ;;  %v1720_v47 = vsel %vm1719_vm5, %v1706_v36, %v1707_v39  ;;  %v1729_v48 = vsel %vm1728_vm6, %v1707_v39, %v1706_v36  ;;  %v1738_v53 = vsel %vm1717_vm4, %v1706_v36, %v1707_v39  ;;  %v1746_v54 = vsel %vm1726_vm7, %v1706_v36, %v1707_v39 }
 0x286   :  { %v1555_v42 = vadd.f32 %v1554_v41, %v1196_v35  ;;  %v1541_v49 = vadd.f32 %v1540_v28, %v1195_v40  ;;  %v1200_v36 = vperm.slane %v3668_v23, 5 }
 0x288   :  { %v1705_v50 = vrot.slane %v1555_v42, 6  ;;  %v1570_v51 = vpop.f32.mrf.mxu0  ;;  %v1584_v52 = vpop.f32.mrf.mxu1 }
 0x289   :  { %v1571_v55 = vadd.f32 %v1570_v51, %v1197_v24  ;;  %v1585_v56 = vadd.f32 %v1584_v52, %v1198_v26  ;;  %v1681_v26 = vunpack.c.l.bf16 %v3003_v31 }
 0x28a   :  { %v1718_v57 = vsel %vm1717_vm4, %v1541_v49, %v1705_v50  ;;  %v1727_v58 = vsel %vm1726_vm7, %v1541_v49, %v1705_v50  ;;  %v1737_v59 = vsel %vm1719_vm5, %v1541_v49, %v1705_v50  ;;  %v1745_v60 = vsel %vm1728_vm6, %v1705_v50, %v1541_v49 }
 0x28b   :  { %v1722_v61 = vsel %vm1721_vm8, %v1718_v57, %v1720_v47  ;;  %v1731_v62 = vsel %vm1730_vm11, %v1727_v58, %v1729_v48  ;;  %v1739_v63 = vsel %vm1721_vm8, %v1738_v53, %v1737_v59  ;;  %v1747_v0 = vsel %vm1730_vm11, %v1746_v54, %v1745_v60 }
 0x28c   :  { %v1732_v1 = vrot.slane %v1731_v62, 2  ;;  %v1740_v2 = vrot.slane %v1739_v63, 4  ;;  %v1748_v3 = vrot.slane %v1747_v0, 6  ;;  %v1799_v4 = vsub.f32 %v1673_v43, %v1722_v61 }
 0x28d   :  { %v1556_v5 = vpop.f32.mrf.mxu2  ;;  %v1542_v12 = vpop.f32.mrf.mxu3  ;;  %v1712_v13 = vrot.slane %v1571_v55, 4  ;;  %v1713_v14 = vrot.slane %v1585_v56, 2  ;;  %v1199_v59 = vperm.slane %v3668_v23, 4  ;;  %v1674_v0 = vunpack.c.h.bf16 %v2949_v19 }
 0x28e   :  { %v1801_v7 = vsub.f32 %v1675_v44, %v1732_v1  ;;  %v1803_v8 = vsub.f32 %v1677_v45, %v1740_v2  ;;  %v1805_v10 = vsub.f32 %v1679_v46, %v1748_v3  ;;  %v1815_v11 = vmul.f32 %v1799_v4, %v1799_v4 }
 0x28f   :  { %v1557_v24 = vadd.f32 %v1556_v5, %v1196_v35  ;;  %v1754_v39 = vsel %vm1719_vm5, %v1712_v13, %v1713_v14  ;;  %v1543_v35 = vadd.f32 %v1542_v12, %v1195_v40  ;;  %v1760_v42 = vsel %vm1728_vm6, %v1713_v14, %v1712_v13 }
 0x290   :  { %v1817_v16 = vmul.f32 %v1801_v7, %v1801_v7  ;;  %v1819_v17 = vmul.f32 %v1803_v8, %v1803_v8  ;;  %v1821_v18 = vmul.f32 %v1805_v10, %v1805_v10  ;;  %1847 = vst [vmem:[#allocation1] ss:$4 sm:$0xff] %v1815_v11  ;;  %v1624_v21 = vpop.f32.mrf.mxu0  ;;  %v1638_v22 = vpop.f32.mrf.mxu1  ;;  %v1768_v43 = vsel %vm1717_vm4, %v1712_v13, %v1713_v14 }
 0x291   :  { %v1625_v27 = vadd.f32 %v1624_v21, %v1201_v6  ;;  %v1711_v28 = vrot.slane %v1557_v24, 6  ;;  %v1639_v41 = vadd.f32 %v1638_v22, %v1202_v15  ;;  %v1776_v44 = vsel %vm1726_vm7, %v1712_v13, %v1713_v14 }
 0x292   :  { %1849 = vst [vmem:[#allocation1 + $0x1] ss:$4 sm:$0xff] %v1817_v16  ;;  %v1676_v2 = vunpack.c.h.bf16 %v2951_v20  ;;  %v1678_v3 = vunpack.c.h.bf16 %v2973_v25  ;;  %v1680_v4 = vunpack.c.h.bf16 %v2993_v29 }
 0x293   :  { %1851 = vst [vmem:[#allocation1 + $0x2] ss:$4 sm:$0xff] %v1819_v17  ;;  %v1709_v45 = vrot.slane %v1625_v27, 4  ;;  %v1753_v46 = vsel %vm1717_vm4, %v1543_v35, %v1711_v28  ;;  %v1759_v47 = vsel %vm1726_vm7, %v1543_v35, %v1711_v28  ;;  %v1767_v48 = vsel %vm1719_vm5, %v1543_v35, %v1711_v28 }
 0x294   :  { %1853 = vst [vmem:[#allocation1 + $0x3] ss:$4 sm:$0xff] %v1821_v18  ;;  %v1775_v40 = vsel %vm1728_vm6, %v1711_v28, %v1543_v35  ;;  %v1755_v49 = vsel %vm1721_vm8, %v1753_v46, %v1754_v39  ;;  %v1761_v50 = vsel %vm1730_vm11, %v1759_v47, %v1760_v42  ;;  %v1769_v51 = vsel %vm1721_vm8, %v1768_v43, %v1767_v48 }
 0x295   :  { %v1777_v52 = vsel %vm1730_vm11, %v1776_v44, %v1775_v40  ;;  %v1610_v53 = vpop.f32.mrf.mxu2  ;;  %v1762_v54 = vrot.slane %v1761_v50, 2  ;;  %v1770_v55 = vrot.slane %v1769_v51, 4  ;;  %v1710_v57 = vrot.slane %v1639_v41, 2  ;;  %v1596_v60 = vpop.f32.mrf.mxu3 }
 0x296   :  { %v1778_v56 = vrot.slane %v1777_v52, 6  ;;  %v1807_v58 = vsub.f32 %v1681_v26, %v1755_v49  ;;  %v1611_v1 = vadd.f32 %v1610_v53, %v1200_v36  ;;  %v1597_v17 = vadd.f32 %v1596_v60, %v1199_v59 }
 0x297   :  { %v1809_v61 = vsub.f32 %v1683_v30, %v1762_v54  ;;  %v1811_v62 = vsub.f32 %v1685_v32, %v1770_v55  ;;  %v1724_v10 = vsel %vm1719_vm5, %v1709_v45, %v1710_v57  ;;  %v1734_v11 = vsel %vm1728_vm6, %v1710_v57, %v1709_v45 }
 0x298   :  { %v1813_v63 = vsub.f32 %v1687_v33, %v1778_v56  ;;  %v1626_v5 = vpop.f32.mrf.mxu0  ;;  %v1640_v7 = vpop.f32.mrf.mxu1  ;;  %v1742_v12 = vsel %vm1717_vm4, %v1709_v45, %v1710_v57  ;;  %v1823_v14 = vmul.f32 %v1807_v58, %v1807_v58  ;;  %v1708_v18 = vrot.slane %v1611_v1, 6 }
 0x299   :  { %v1825_v8 = vmul.f32 %v1809_v61, %v1809_v61  ;;  %v1827_v16 = vmul.f32 %v1811_v62, %v1811_v62  ;;  %v1750_v25 = vsel %vm1726_vm7, %v1709_v45, %v1710_v57  ;;  %v1627_v29 = vadd.f32 %v1626_v5, %v1201_v6 }
 0x29a   :  { %v1829_v21 = vmul.f32 %v1813_v63, %v1813_v63  ;;  %v1641_v22 = vadd.f32 %v1640_v7, %v1202_v15  ;;  %v1723_v26 = vsel %vm1717_vm4, %v1597_v17, %v1708_v18  ;;  %v1733_v27 = vsel %vm1726_vm7, %v1597_v17, %v1708_v18 }
 0x29b   :  { %v1862_v13 = vld.sshfl [vmem:[#allocation1] sm:$0xff pattern:$0x73625140]  ;;  %v1863_v19 = vld.sshfl [vmem:[#allocation1 + $0x8] sm:$0xff pattern:$0x73625140]  ;;  %v1741_v30 = vsel %vm1719_vm5, %v1597_v17, %v1708_v18  ;;  %v1749_v32 = vsel %vm1728_vm6, %v1708_v18, %v1597_v17  ;;  %v1725_v33 = vsel %vm1721_vm8, %v1723_v26, %v1724_v10  ;;  %v1735_v39 = vsel %vm1730_vm11, %v1733_v27, %v1734_v11 }
 0x29c   :  { %v1864_v20 = vld.sshfl [vmem:[#allocation1 + $0x10] sm:$0xff pattern:$0x73625140]  ;;  %v1865_v24 = vld.sshfl [vmem:[#allocation1 + $0x18] sm:$0xff pattern:$0x73625140]  ;;  %v1743_v35 = vsel %vm1721_vm8, %v1742_v12, %v1741_v30  ;;  %v1751_v6 = vsel %vm1730_vm11, %v1750_v25, %v1749_v32  ;;  %v1800_v42 = vsub.f32 %v1674_v0, %v1725_v33  ;;  %v1682_v51 = vunpack.c.h.bf16 %v3003_v31 }
 0x29d   :  { %1870 = vst [vmem:[#allocation1] ss:$4 sm:$0xff] %v1823_v14  ;;  %v1736_v15 = vrot.slane %v1735_v39, 2  ;;  %v1744_v28 = vrot.slane %v1743_v35, 4  ;;  %v1752_v41 = vrot.slane %v1751_v6, 6  ;;  %v1612_v43 = vpop.f32.mrf.mxu2  ;;  %v1715_v44 = vrot.slane %v1627_v29, 4  ;;  %v1598_v49 = vpop.f32.mrf.mxu3 }
 0x29e   :  { %1871 = vst [vmem:[#allocation1 + $0x1] ss:$4 sm:$0xff] %v1825_v8  ;;  %v1716_v45 = vrot.slane %v1641_v22, 2  ;;  %v1816_v40 = vmul.f32 %v1800_v42, %v1800_v42  ;;  %v1613_v50 = vadd.f32 %v1612_v43, %v1200_v36  ;;  %v1684_v52 = vunpack.c.h.bf16 %v3016_v34 }
 0x29f   :  { %1872 = vst [vmem:[#allocation1 + $0x2] ss:$4 sm:$0xff] %v1827_v16  ;;  %v1802_v46 = vsub.f32 %v1676_v2, %v1736_v15  ;;  %v1804_v47 = vsub.f32 %v1678_v3, %v1744_v28  ;;  %v1806_v48 = vsub.f32 %v1680_v4, %v1752_v41  ;;  %v1686_v56 = vunpack.c.h.bf16 %v3029_v37  ;;  %v1929_v15 = vld [vmem:[%s3776_s11] sm:$0x1] }
 0x2a0   :  { %1873 = vst [vmem:[#allocation1 + $0x3] ss:$4 sm:$0xff] %v1829_v21  ;;  %v1599_v57 = vadd.f32 %v1598_v49, %v1199_v59  ;;  %v1688_v58 = vunpack.c.h.bf16 %v3032_v38  ;;  %v1714_v60 = vrot.slane %v1613_v50, 6  ;;  %v1902_v61 = vadd.f32 %v1863_v19, %v1862_v13 }
 0x2a1   :  { %v1818_v53 = vmul.f32 %v1802_v46, %v1802_v46  ;;  %v1820_v54 = vmul.f32 %v1804_v47, %v1804_v47  ;;  %v1822_v55 = vmul.f32 %v1806_v48, %v1806_v48  ;;  %1855 = vst [vmem:[#allocation1 + $0x20] ss:$4 sm:$0xff] %v1816_v40  ;;  %v1757_v62 = vsel %vm1719_vm5, %v1715_v44, %v1716_v45 }
 0x2a2   :  { %v1764_v23 = vsel %vm1728_vm6, %v1716_v45, %v1715_v44  ;;  %v1772_v31 = vsel %vm1717_vm4, %v1715_v44, %v1716_v45  ;;  %v1780_v34 = vsel %vm1726_vm7, %v1715_v44, %v1716_v45  ;;  %v1756_v36 = vsel %vm1717_vm4, %v1599_v57, %v1714_v60 }
 0x2a3   :  { %1857 = vst [vmem:[#allocation1 + $0x21] ss:$4 sm:$0xff] %v1818_v53  ;;  %v1763_v63 = vsel %vm1726_vm7, %v1599_v57, %v1714_v60  ;;  %v1771_v37 = vsel %vm1719_vm5, %v1599_v57, %v1714_v60  ;;  %v1779_v38 = vsel %vm1728_vm6, %v1714_v60, %v1599_v57  ;;  %v1758_v59 = vsel %vm1721_vm8, %v1756_v36, %v1757_v62 }
 0x2a4   :  { %1859 = vst [vmem:[#allocation1 + $0x22] ss:$4 sm:$0xff] %v1820_v54  ;;  %v1765_v0 = vsel %vm1730_vm11, %v1763_v63, %v1764_v23  ;;  %v1773_v1 = vsel %vm1721_vm8, %v1772_v31, %v1771_v37  ;;  %v1781_v2 = vsel %vm1730_vm11, %v1780_v34, %v1779_v38  ;;  %v1903_v7 = vadd.f32 %v1902_v61, %v1864_v20 }
 0x2a5   :  { %1861 = vst [vmem:[#allocation1 + $0x23] ss:$4 sm:$0xff] %v1822_v55  ;;  %v1766_v3 = vrot.slane %v1765_v0, 2  ;;  %v1774_v4 = vrot.slane %v1773_v1, 4  ;;  %v1782_v5 = vrot.slane %v1781_v2, 6  ;;  %v1808_v8 = vsub.f32 %v1682_v51, %v1758_v59 }
 0x2a6   :  { %v1904_v19 = vadd.f32 %v1903_v7, %v1865_v24 }
 0x2a7   :  { %v1810_v10 = vsub.f32 %v1684_v52, %v1766_v3  ;;  %v1812_v11 = vsub.f32 %v1686_v56, %v1774_v4  ;;  %v1814_v12 = vsub.f32 %v1688_v58, %v1782_v5  ;;  %v1824_v14 = vmul.f32 %v1808_v8, %v1808_v8 }
 0x2a9   :  { %v1826_v13 = vmul.f32 %v1810_v10, %v1810_v10  ;;  %v1828_v16 = vmul.f32 %v1812_v11, %v1812_v11  ;;  %v1830_v21 = vmul.f32 %v1814_v12, %v1814_v12 }
 0x2ac   :  { %v1866_v17 = vld.sshfl [vmem:[#allocation1 + $0x20] sm:$0xff pattern:$0x73625140]  ;;  %v1867_v18 = vld.sshfl [vmem:[#allocation1 + $0x28] sm:$0xff pattern:$0x73625140] }
 0x2ad   :  { %v1868_v25 = vld.sshfl [vmem:[#allocation1 + $0x30] sm:$0xff pattern:$0x73625140]  ;;  %v1869_v29 = vld.sshfl [vmem:[#allocation1 + $0x38] sm:$0xff pattern:$0x73625140]  ;;  %v1905_v22 = vadd.f32 %v1904_v19, %v1866_v17 }
 0x2ae   :  { %1874 = vst [vmem:[#allocation1 + $0x20] ss:$4 sm:$0xff] %v1824_v14 }
 0x2af   :  { %1875 = vst [vmem:[#allocation1 + $0x21] ss:$4 sm:$0xff] %v1826_v13  ;;  %v1906_v26 = vadd.f32 %v1905_v22, %v1867_v18 }
 0x2b0   :  { %1876 = vst [vmem:[#allocation1 + $0x22] ss:$4 sm:$0xff] %v1828_v16 }
 0x2b1   :  { %1877 = vst [vmem:[#allocation1 + $0x23] ss:$4 sm:$0xff] %v1830_v21  ;;  %v1907_v20 = vadd.f32 %v1906_v26, %v1868_v25 }
 0x2b3   :  { %v1908_v27 = vadd.f32 %v1907_v20, %v1869_v29 }
 0x2b5   :  { %1909 = vadd.xlane.f32.xlu0 %v1908_v27 }
 0x328   :  { %v1910_v30 = vpop.xlane.xlu0 %1909 }
 0x329   :  { %v1920_v24 = vsel %vm147_vm0, %v1910_v30, 0.0 }
 0x32a   :  { %v1923_v32 = vrot.slane %v1920_v24, 4 }
 0x32c   :  { %v1924_v33 = vadd.f32 %v1923_v32, %v1920_v24 }
 0x32e   :  { %v1925_v39 = vrot.slane %v1924_v33, 2 }
 0x330   :  { %v1926_v35 = vadd.f32 %v1925_v39, %v1924_v33 }
 0x332   :  { %v1927_v6 = vrot.slane %v1926_v35, 1 }
 0x334   :  { %v1928_v28 = vadd.f32 %v1927_v6, %v1926_v35 }
 0x336   :  { %v1930_v41 = vadd.f32 %v1929_v15, %v1928_v28 }
 0x338   :  { %1931 = vst [vmem:[%s3776_s11] sm:$0x1] %v1930_v41 }

</bundles_post_ra>
